<compile_context>
chip_gen: v7x
topology: tpu7x:2x2x1
jax: 0.10.0
libtpu: 0.0.40
codegen_flags: <defaults>
</compile_context>

<pallas_src>
import jax
import jax.numpy as jnp
from jax.experimental import pallas as pl
from jax.experimental.pallas import tpu as pltpu

IN_FEATURES = 2048      # resnet50 fc.in_features
HIDDEN = 512
BN_EPS = 1e-5


def _round_up(x, m):
    return ((x + m - 1) // m) * m


def _choose_tb(B):
    """Batch tile: large (amortize per-step overhead) but >=2 grid steps when
    possible so the batch axis shards across both v7x TensorCores."""
    B8 = _round_up(B, 8)            # f32 sublane granularity
    if B8 <= 16:
        return B8                   # tiny batch: single step, nothing to shard
    return min(1024, _round_up(pl.cdiv(B, 2), 8))


def _head_kernel(x_ref, w1_ref, scale_ref, b1_ref, w2_ref, b2_ref, out_ref):
    # x_ref:     [TB, 2048] f32 or bf16 (cast to bf16 here, free VPU work)
    # w1_ref:    [2048, 512] bf16 (unscaled)
    # scale_ref: [1, 512]    f32  (gamma * rsqrt(var + eps), applied to f32 acc)
    # b1_ref:    [1, 512]    f32  ((b1 - mean) * scale + beta)
    # w2_ref:    [512, C_pad] bf16, b2_ref: [1, C_pad] f32
    x = x_ref[...].astype(jnp.bfloat16)

    # angle_branch Linear(2048 -> 512): bf16 MXU inputs, f32 accumulation;
    # eval-mode BatchNorm1d applied as f32 scale/shift on the accumulator.
    h = jnp.dot(x, w1_ref[...], preferred_element_type=jnp.float32)
    h = h * scale_ref[...] + b1_ref[...]

    # ReLU. (Dropout(0.5) is identity in eval mode.)
    h = jnp.maximum(h, 0.0)

    # classifier Linear(512 -> C_pad): bf16 MXU inputs, f32 accumulation.
    out = jnp.dot(h.astype(jnp.bfloat16), w2_ref[...],
                  preferred_element_type=jnp.float32)
    out_ref[...] = (out + b2_ref[...]).astype(out_ref.dtype)


def prepare_head_params(params):
    """One-time parameter prep (call once at init, reuse across inferences):
    fold eval-mode BN stats, cast weights to bf16, pad classes lane-dense."""
    w1, b1, gamma, beta, run_mean, run_var, w2, b2 = params
    F, H = w1.shape
    C = w2.shape[1]

    # Eval-mode BatchNorm1d: y = (z - mean) * gamma/sqrt(var+eps) + beta
    scale = (gamma * jax.lax.rsqrt(run_var + BN_EPS)).astype(jnp.float32)   # (1, H)
    b1_fold = ((b1 - run_mean) * scale + beta).astype(jnp.float32)          # (1, H)

    # Lane-dense output: pad classes to a multiple of 128 (zero columns).
    C_pad = _round_up(C, 128)
    w2_p = jnp.pad(w2, ((0, 0), (0, C_pad - C))).astype(jnp.bfloat16)
    b2_p = jnp.pad(b2, ((0, 0), (0, C_pad - C))).astype(jnp.float32)

    return {
        "w1": w1.astype(jnp.bfloat16),   # unscaled; BN scale stays f32
        "scale": scale,
        "b1": b1_fold,
        "w2": w2_p,
        "b2": b2_p,
        "num_classes": C,
    }


def angle_aware_cnn_head(x_feat, prepared, *, out_dtype=jnp.float32):
    """x_feat: [B, 2048] backbone features (f32 or bf16).
    prepared: output of prepare_head_params(). Returns [B, num_classes]."""
    w1, scale, b1 = prepared["w1"], prepared["scale"], prepared["b1"]
    w2, b2 = prepared["w2"], prepared["b2"]
    C = prepared["num_classes"]

    B, F = x_feat.shape
    H = w1.shape[1]
    C_pad = w2.shape[1]
    assert F == w1.shape[0] and H == w2.shape[0]

    TB = _choose_tb(B)
    B_pad = _round_up(B, TB)
    if B_pad != B:
        x_feat = jnp.pad(x_feat, ((0, B_pad - B), (0, 0)))

    grid = (B_pad // TB,)

    out = pl.pallas_call(
        _head_kernel,
        out_shape=jax.ShapeDtypeStruct((B_pad, C_pad), out_dtype),
        grid=grid,
        in_specs=[
            pl.BlockSpec((TB, F), lambda i: (i, 0)),      # x tile (pipelined)
            pl.BlockSpec((F, H), lambda i: (0, 0)),       # w1 (VMEM-resident)
            pl.BlockSpec((1, H), lambda i: (0, 0)),       # BN scale (f32)
            pl.BlockSpec((1, H), lambda i: (0, 0)),       # folded bias (f32)
            pl.BlockSpec((H, C_pad), lambda i: (0, 0)),   # w2
            pl.BlockSpec((1, C_pad), lambda i: (0, 0)),   # b2
        ],
        out_specs=pl.BlockSpec((TB, C_pad), lambda i: (i, 0)),
        compiler_params=pltpu.CompilerParams(
            dimension_semantics=("parallel",),
            vmem_limit_bytes=32 << 20,
        ),
    )(x_feat, w1, scale, b1, w2, b2)

    return out[:B, :C]


def init_params(key, num_classes):
    """Deterministic synthetic parameters matching AngleAwareCNN head shapes."""
    k1, k2, k3, k4 = jax.random.split(key, 4)
    w1 = jax.random.normal(k1, (IN_FEATURES, HIDDEN), jnp.float32) * 0.02
    b1 = jax.random.normal(k2, (1, HIDDEN), jnp.float32) * 0.01
    gamma = jnp.ones((1, HIDDEN), jnp.float32)
    beta = jnp.zeros((1, HIDDEN), jnp.float32)
    run_mean = jnp.zeros((1, HIDDEN), jnp.float32)
    run_var = jnp.ones((1, HIDDEN), jnp.float32)
    w2 = jax.random.normal(k3, (HIDDEN, num_classes), jnp.float32) * 0.02
    b2 = jax.random.normal(k4, (1, num_classes), jnp.float32) * 0.01
    return (w1, b1, gamma, beta, run_mean, run_var, w2, b2)


def reference(x_feat, params):
    """Pure-JAX f32 reference (eval-mode semantics)."""
    w1, b1, gamma, beta, run_mean, run_var, w2, b2 = params
    h = x_feat @ w1 + b1
    h = (h - run_mean) * jax.lax.rsqrt(run_var + BN_EPS) * gamma + beta
    h = jnp.maximum(h, 0.0)
    return h @ w2 + b2


if __name__ == "__main__":
    num_classes = 5
    batch = 2

    key = jax.random.PRNGKey(0)
    kx, kp = jax.random.split(key)
    # Synthetic backbone features (output of resnet50 with fc = Identity).
    x_feat = jax.random.normal(kx, (batch, IN_FEATURES), jnp.float32)
    params = init_params(kp, num_classes)

    # One-time prep (hoisted out of the per-inference hot path).
    prepared = prepare_head_params(params)
    prepared = jax.tree_util.tree_map(
        lambda a: jax.block_until_ready(a) if isinstance(a, jax.Array) else a,
        prepared)

    out = angle_aware_cnn_head(x_feat, prepared)
    out = jax.block_until_ready(out)

    ref = reference(x_feat, params)
    assert out.shape == (batch, num_classes)
    # bf16 weight/activation MXU inputs -> loosened tolerance vs f32 reference.
    assert jnp.allclose(out, ref, atol=5e-2, rtol=5e-2), "mismatch vs reference"

    print("KERNEL_OK")
</pallas_src>

<mosaic_0001>
module attributes {stable_mosaic.version = 11 : i64} {
  func.func @_head_kernel(%arg0: i32, %arg1: memref<8x2048xf32, #tpu.memory_space<vmem>>, %arg2: memref<2048x512xbf16, #tpu.memory_space<vmem>>, %arg3: memref<1x512xf32, #tpu.memory_space<vmem>>, %arg4: memref<1x512xf32, #tpu.memory_space<vmem>>, %arg5: memref<512x128xbf16, #tpu.memory_space<vmem>>, %arg6: memref<1x128xf32, #tpu.memory_space<vmem>>, %arg7: memref<8x128xf32, #tpu.memory_space<vmem>>) attributes {dimension_semantics = [#tpu.dimension_semantics<parallel>], iteration_bounds = array<i64: 1>, scalar_prefetch = 0 : i64, scratch_operands = 0 : i64, tpu.core_type = #tpu.core_type<tc>, window_params = [{transform_indices = @transform_0, window_bounds = array<i64: 8, 2048>}, {pipeline_mode = #tpu.pipeline_mode<synchronous>, transform_indices = @transform_1, window_bounds = array<i64: 2048, 512>}, {pipeline_mode = #tpu.pipeline_mode<synchronous>, transform_indices = @transform_2, window_bounds = array<i64: 1, 512>}, {pipeline_mode = #tpu.pipeline_mode<synchronous>, transform_indices = @transform_3, window_bounds = array<i64: 1, 512>}, {pipeline_mode = #tpu.pipeline_mode<synchronous>, transform_indices = @transform_4, window_bounds = array<i64: 512, 128>}, {pipeline_mode = #tpu.pipeline_mode<synchronous>, transform_indices = @transform_5, window_bounds = array<i64: 1, 128>}, {transform_indices = @transform_6, window_bounds = array<i64: 8, 128>}]} {
    %c0 = arith.constant 0 : index
    %c0_0 = arith.constant 0 : index
    %0 = vector.load %arg1[%c0, %c0_0] : memref<8x2048xf32, #tpu.memory_space<vmem>>, vector<8x2048xf32>
    %1 = arith.truncf %0 : vector<8x2048xf32> to vector<8x2048xbf16>
    %c0_1 = arith.constant 0 : index
    %c0_2 = arith.constant 0 : index
    %2 = vector.load %arg2[%c0_1, %c0_2] : memref<2048x512xbf16, #tpu.memory_space<vmem>>, vector<2048x512xbf16>
    %cst = arith.constant dense<0.000000e+00> : vector<8x512xf32>
    %3 = tpu.matmul %1, %2, %cst {dimension_numbers = #tpu.dot_dimension_numbers<[1], [0], [0], [1], [0, 0, 1, 1], [], []>} : vector<8x2048xbf16>, vector<2048x512xbf16>, vector<8x512xf32> -> vector<8x512xf32>
    %c0_3 = arith.constant 0 : index
    %c0_4 = arith.constant 0 : index
    %4 = vector.load %arg3[%c0_3, %c0_4] : memref<1x512xf32, #tpu.memory_space<vmem>>, vector<1x512xf32>
    %5 = vector.broadcast %4 : vector<1x512xf32> to vector<8x512xf32>
    %6 = arith.mulf %3, %5 : vector<8x512xf32>
    %c0_5 = arith.constant 0 : index
    %c0_6 = arith.constant 0 : index
    %7 = vector.load %arg4[%c0_5, %c0_6] : memref<1x512xf32, #tpu.memory_space<vmem>>, vector<1x512xf32>
    %8 = vector.broadcast %7 : vector<1x512xf32> to vector<8x512xf32>
    %9 = arith.addf %6, %8 : vector<8x512xf32>
    %cst_7 = arith.constant 0.000000e+00 : f32
    %10 = vector.broadcast %cst_7 : f32 to vector<8x512xf32>
    %11 = arith.maximumf %9, %10 : vector<8x512xf32>
    %12 = arith.truncf %11 : vector<8x512xf32> to vector<8x512xbf16>
    %c0_8 = arith.constant 0 : index
    %c0_9 = arith.constant 0 : index
    %13 = vector.load %arg5[%c0_8, %c0_9] : memref<512x128xbf16, #tpu.memory_space<vmem>>, vector<512x128xbf16>
    %cst_10 = arith.constant dense<0.000000e+00> : vector<8x128xf32>
    %14 = tpu.matmul %12, %13, %cst_10 {dimension_numbers = #tpu.dot_dimension_numbers<[1], [0], [0], [1], [0, 0, 1, 1], [], []>} : vector<8x512xbf16>, vector<512x128xbf16>, vector<8x128xf32> -> vector<8x128xf32>
    %c0_11 = arith.constant 0 : index
    %c0_12 = arith.constant 0 : index
    %15 = vector.load %arg6[%c0_11, %c0_12] : memref<1x128xf32, #tpu.memory_space<vmem>>, vector<1x128xf32>
    %16 = vector.broadcast %15 : vector<1x128xf32> to vector<8x128xf32>
    %17 = arith.addf %14, %16 : vector<8x128xf32>
    %c0_13 = arith.constant 0 : index
    %c0_14 = arith.constant 0 : index
    %18 = vector.load %arg7[%c0_13, %c0_14] : memref<8x128xf32, #tpu.memory_space<vmem>>, vector<8x128xf32>
    tpu.vector_store %arg7[%c0_13, %c0_14], %17 {strides = array<i32>} : memref<8x128xf32, #tpu.memory_space<vmem>>, vector<8x128xf32>,
    return
  }
  func.func @transform_0(%arg0: i32) -> (i32, i32) {
    %c0_i32 = arith.constant 0 : i32
    %c0_i32_0 = arith.constant 0 : i32
    return %arg0, %c0_i32 : i32, i32
  }
  func.func @transform_1(%arg0: i32) -> (i32, i32) {
    %c0_i32 = arith.constant 0 : i32
    %c0_i32_0 = arith.constant 0 : i32
    %c0_i32_1 = arith.constant 0 : i32
    return %c0_i32, %c0_i32_0 : i32, i32
  }
  func.func @transform_2(%arg0: i32) -> (i32, i32) {
    %c0_i32 = arith.constant 0 : i32
    %c0_i32_0 = arith.constant 0 : i32
    %c0_i32_1 = arith.constant 0 : i32
    return %c0_i32, %c0_i32_0 : i32, i32
  }
  func.func @transform_3(%arg0: i32) -> (i32, i32) {
    %c0_i32 = arith.constant 0 : i32
    %c0_i32_0 = arith.constant 0 : i32
    %c0_i32_1 = arith.constant 0 : i32
    return %c0_i32, %c0_i32_0 : i32, i32
  }
  func.func @transform_4(%arg0: i32) -> (i32, i32) {
    %c0_i32 = arith.constant 0 : i32
    %c0_i32_0 = arith.constant 0 : i32
    %c0_i32_1 = arith.constant 0 : i32
    return %c0_i32, %c0_i32_0 : i32, i32
  }
  func.func @transform_5(%arg0: i32) -> (i32, i32) {
    %c0_i32 = arith.constant 0 : i32
    %c0_i32_0 = arith.constant 0 : i32
    %c0_i32_1 = arith.constant 0 : i32
    return %c0_i32, %c0_i32_0 : i32, i32
  }
  func.func @transform_6(%arg0: i32) -> (i32, i32) {
    %c0_i32 = arith.constant 0 : i32
    %c0_i32_0 = arith.constant 0 : i32
    return %arg0, %c0_i32 : i32, i32
  }
}

</mosaic_0001>

<bundles_post_ra>
// kernel: tpu_custom_call.1
= control target key start
LH: loop header
LB: loop body
LE: loop exit
PB: predicated region body
PF: predicated region fallthrough
CT: control target
= control target key end

     0   :  { %11 = vsyncpa [#allocation3], 0  ;;  %s6031_s0 = inlined_call_operand.hbm [shape: f32[8,2048], index: 0, kind: input, shape index: {}]   ;;  %s6032_s1 = inlined_call_operand.hbm [shape: bf16[2048,512], index: 1, kind: input, shape index: {}]   ;;  %s6033_s2 = inlined_call_operand.hbm [shape: f32[1,512], index: 2, kind: input, shape index: {}]   ;;  %s6034_s3 = inlined_call_operand.hbm [shape: f32[1,512], index: 3, kind: input, shape index: {}]   ;;  %s6035_s4 = inlined_call_operand.hbm [shape: bf16[512,128], index: 4, kind: input, shape index: {}]   ;;  %s6036_s5 = inlined_call_operand.hbm [shape: f32[1,128], index: 5, kind: input, shape index: {}]   ;;  %s6037_s6 = inlined_call_operand.hbm [shape: f32[8,128], index: 6, kind: output, shape index: {}]  }
   0x1   :  { %12 = vsyncpa [#allocation6], 0 }
   0x2   :  { %13 = vsyncpa [#allocation9], 0 }
   0x3   :  { %14 = vsyncpa [#allocation12], 0 }
   0x4   :  { %15 = vsyncpa [#allocation4], 0  ;;  %s5901_s21 = smov [#allocation5]   ;;  %s5737_s25 = scalar_lea.hbm %s6032_s1, 65536 }
   0x5   :  { %s31_s22 = sshll.u32 %s5901_s21, 4  ;;  %p5738_p0 = scmp.ne.s32.totalorder %s6032_s1, %s5737_s25  ;;  %s32_s22 = int_to_ptr.vmem [resolvable:$true] %s31_s22 }
   0x6   :  { %p5741_p1 = scmp.lt.u32.totalorder %s5737_s25, %s6032_s1 }
   0x8   :  { %p5743_p2 = pnand %p5741_p1, %p5738_p0 }
   0xa   :  { %5746 = shalt.err (!%p5743_p2)
}
   0xb   :  { %s5747_s30 = scalar_lea.vmem %s32_s22, 65536  ;;  %p5752_p4 = scmp.lt.s32.totalorder %s32_s22, %s32_s22 }
   0xc   :  { %p5748_p3 = scmp.ne.s32.totalorder %s32_s22, %s5747_s30  ;;  %p5753_p5 = scmp.lt.s32.totalorder %s5747_s30, %s5747_s30 }
   0xe   :  { %p5754_p6 = por %p5753_p5, %p5752_p4 }
  0x10   :  { %p5755_p7 = pnand %p5754_p6, %p5748_p3 }
  0x12   :  { %5758 = shalt.err (!%p5755_p7)
}
  0x13   :  { %s5902_s7 = smov 256   ;;  %s5903_s8 = smov 16  }
  0x14   :  { %37 = dma.hbm_to_vmem [thread:$0]  %s6032_s1, 65536, %s32_s22, [#allocation6], %s5902_s7, %s5902_s7, %s5903_s8  }
  0x15   :  { %s5904_s11 = smov [#allocation8]   ;;  %s5905_s13 = smov [#allocation2]  }
  0x16   :  { %s54_s12 = sshll.u32 %s5904_s11, 4  ;;  %s22_s14 = sshll.u32 %s5905_s13, 4  ;;  %s55_s12 = int_to_ptr.vmem [resolvable:$true] %s54_s12  ;;  %s23_s14 = int_to_ptr.vmem [resolvable:$true] %s22_s14 }
  0x17   :  { %s5759_s17 = scalar_lea.hbm %s6034_s3, 64 }
  0x18   :  { %p5760_p8 = scmp.ne.s32.totalorder %s6034_s3, %s5759_s17  ;;  %p5763_p9 = scmp.lt.u32.totalorder %s5759_s17, %s6034_s3 }
  0x1a   :  { %p5765_p10 = pnand %p5763_p9, %p5760_p8 }
  0x1c   :  { %5768 = shalt.err (!%p5765_p10)
}
  0x1d   :  { %s5769_s1 = scalar_lea.vmem %s55_s12, 64  ;;  %p5774_p12 = scmp.lt.s32.totalorder %s55_s12, %s55_s12 }
  0x1e   :  { %p5770_p11 = scmp.ne.s32.totalorder %s55_s12, %s5769_s1  ;;  %p5775_p13 = scmp.lt.s32.totalorder %s5769_s1, %s5769_s1 }
  0x20   :  { %p5776_p0 = por %p5775_p13, %p5774_p12 }
  0x22   :  { %p5777_p1 = pnand %p5776_p0, %p5770_p11 }
  0x24   :  { %5780 = shalt.err (!%p5777_p1)
}
  0x25   :  { %57 = dma.hbm_to_vmem [thread:$0]  %s6034_s3, 64, %s55_s12, [#allocation9]  }
  0x26   :  { %s5781_s26 = scalar_lea.hbm %s6031_s0, 2048 }
  0x27   :  { %p5782_p2 = scmp.ne.s32.totalorder %s6031_s0, %s5781_s26  ;;  %p5785_p3 = scmp.lt.u32.totalorder %s5781_s26, %s6031_s0 }
  0x29   :  { %p5787_p4 = pnand %p5785_p3, %p5782_p2 }
  0x2b   :  { %5790 = shalt.err (!%p5787_p4)
}
  0x2c   :  { %s5791_s7 = scalar_lea.vmem %s23_s14, 2048  ;;  %p5796_p6 = scmp.lt.s32.totalorder %s23_s14, %s23_s14 }
  0x2d   :  { %p5792_p5 = scmp.ne.s32.totalorder %s23_s14, %s5791_s7  ;;  %p5797_p7 = scmp.lt.s32.totalorder %s5791_s7, %s5791_s7 }
  0x2f   :  { %p5798_p8 = por %p5797_p7, %p5796_p6 }
  0x31   :  { %p5799_p9 = pnand %p5798_p8, %p5792_p5 }
  0x33   :  { %5802 = shalt.err (!%p5799_p9)
}
  0x34   :  { %25 = dma.hbm_to_vmem [thread:$0]  %s6031_s0, 2048, %s23_s14, [#allocation3]  }
  0x35   :  { %s5906_s9 = smov [#allocation7]   ;;  %s5907_s11 = smov [#allocation10]  }
  0x36   :  { %s44_s10 = sshll.u32 %s5906_s9, 4  ;;  %s63_s12 = sshll.u32 %s5907_s11, 4  ;;  %s45_s10 = int_to_ptr.vmem [resolvable:$true] %s44_s10  ;;  %s64_s12 = int_to_ptr.vmem [resolvable:$true] %s63_s12 }
  0x37   :  { %s5803_s16 = scalar_lea.hbm %s6033_s2, 64 }
  0x38   :  { %p5804_p10 = scmp.ne.s32.totalorder %s6033_s2, %s5803_s16  ;;  %p5807_p11 = scmp.lt.u32.totalorder %s5803_s16, %s6033_s2 }
  0x3a   :  { %p5809_p12 = pnand %p5807_p11, %p5804_p10 }
  0x3c   :  { %5812 = shalt.err (!%p5809_p12)
}
  0x3d   :  { %s5813_s0 = scalar_lea.vmem %s45_s10, 64  ;;  %p5818_p0 = scmp.lt.s32.totalorder %s45_s10, %s45_s10 }
  0x3e   :  { %p5814_p13 = scmp.ne.s32.totalorder %s45_s10, %s5813_s0  ;;  %p5819_p1 = scmp.lt.s32.totalorder %s5813_s0, %s5813_s0 }
  0x40   :  { %p5820_p2 = por %p5819_p1, %p5818_p0 }
  0x42   :  { %p5821_p3 = pnand %p5820_p2, %p5814_p13 }
  0x44   :  { %5824 = shalt.err (!%p5821_p3)
}
  0x45   :  { %47 = dma.hbm_to_vmem [thread:$0]  %s6033_s2, 64, %s45_s10, [#allocation6]  }
  0x46   :  { %s5825_s23 = scalar_lea.hbm %s6035_s4, 4096 }
  0x47   :  { %p5826_p4 = scmp.ne.s32.totalorder %s6035_s4, %s5825_s23  ;;  %p5829_p5 = scmp.lt.u32.totalorder %s5825_s23, %s6035_s4 }
  0x49   :  { %p5831_p6 = pnand %p5829_p5, %p5826_p4 }
  0x4b   :  { %5834 = shalt.err (!%p5831_p6)
}
  0x4c   :  { %s5835_s28 = scalar_lea.vmem %s64_s12, 4096  ;;  %p5840_p8 = scmp.lt.s32.totalorder %s64_s12, %s64_s12 }
  0x4d   :  { %p5836_p7 = scmp.ne.s32.totalorder %s64_s12, %s5835_s28  ;;  %p5841_p9 = scmp.lt.s32.totalorder %s5835_s28, %s5835_s28 }
  0x4f   :  { %p5842_p10 = por %p5841_p9, %p5840_p8 }
  0x51   :  { %p5843_p11 = pnand %p5842_p10, %p5836_p7 }
  0x53   :  { %5846 = shalt.err (!%p5843_p11)
}
  0x54   :  { %s5908_s2 = smov 64   ;;  %s5909_s29 = smov 4  }
  0x55   :  { %69 = dma.hbm_to_vmem [thread:$0]  %s6035_s4, 4096, %s64_s12, [#allocation9], %s5908_s2, %s5908_s2, %s5909_s29  }
  0x56   :  { %s5910_s3 = smov [#allocation11]   ;;  %s5847_s11 = scalar_lea.hbm %s6036_s5, 16 }
  0x57   :  { %s76_s8 = sshll.u32 %s5910_s3, 4  ;;  %p5848_p12 = scmp.ne.s32.totalorder %s6036_s5, %s5847_s11  ;;  %s77_s8 = int_to_ptr.vmem [resolvable:$true] %s76_s8 }
  0x58   :  { %p5851_p13 = scmp.lt.u32.totalorder %s5847_s11, %s6036_s5 }
  0x5a   :  { %p5853_p0 = pnand %p5851_p13, %p5848_p12 }
  0x5c   :  { %5856 = shalt.err (!%p5853_p0)
}
  0x5d   :  { %s5857_s18 = scalar_lea.vmem %s77_s8, 16  ;;  %s5861_s4 = scalar_lea.vmem %s77_s8, 32 }
  0x5e   :  { %p5858_p1 = scmp.ne.s32.totalorder %s77_s8, %s5857_s18  ;;  %p5862_p2 = scmp.lt.s32.totalorder %s77_s8, %s77_s8 }
  0x5f   :  { %p5863_p3 = scmp.lt.s32.totalorder %s5861_s4, %s5857_s18 }
  0x61   :  { %p5864_p4 = por %p5863_p3, %p5862_p2 }
  0x63   :  { %p5865_p5 = pnand %p5864_p4, %p5858_p1 }
  0x65   :  { %5868 = shalt.err (!%p5865_p5)
}
  0x66   :  { %79 = dma.hbm_to_vmem [thread:$0]  %s6036_s5, 16, %s77_s8, [#allocation12]  }
  0x67   :  { %5891 = dma.done.wait [#allocation3], 2048  }
  0x68   :  { %5892 = vsyncadd [#allocation3], 4294965248 }
  0x69   :  { %5893 = dma.done.wait [#allocation6], 65600  }
  0x6a   :  { %5894 = vsyncadd [#allocation6], 4294901696 }
  0x6b   :  { %5895 = dma.done.wait [#allocation9], 4160  }
  0x6c   :  { %5896 = vsyncadd [#allocation9], 4294963136 }
  0x6d   :  { %5897 = dma.done.wait [#allocation12], 16  }
  0x6e   :  { %5898 = vsyncadd [#allocation12], 4294967280  ;;  %v4937_v0 = vld [vmem:[#allocation5 + $0x4] ss:$16 sps:$4 sm:$0xff]   ;;  %v4939_v1 = vld [vmem:[#allocation5 + $0xc] ss:$16 sps:$4 sm:$0xff]  }
  0x6f   :  { %3203 = vmatprep.subr.bf16.mxu0 %v4937_v0  ;;  %v4941_v2 = vld [vmem:[#allocation5] ss:$16 sps:$4 sm:$0xff]   ;;  %v4942_v3 = vld [vmem:[#allocation5 + $0x8] ss:$16 sps:$4 sm:$0xff]   ;;  %3531 = vmatprep.subr.bf16.mxu1 %v4939_v1  ;;  %v4943_v4 = vld [vmem:[#allocation5 + $0x24] ss:$16 sps:$4 sm:$0xff]  }
  0x70   :  { %3204 = vmatpush1.bf16.msra.mxu0 %v4941_v2  ;;  %3532 = vmatpush1.bf16.msra.mxu1 %v4942_v3  ;;  %v4945_v5 = vld [vmem:[#allocation5 + $0x2c] ss:$16 sps:$4 sm:$0xff]   ;;  %v4947_v6 = vld [vmem:[#allocation5 + $0x20] ss:$16 sps:$4 sm:$0xff]   ;;  %v4948_v7 = vld [vmem:[#allocation5 + $0x28] ss:$16 sps:$4 sm:$0xff]  }
  0x71   :  { %3205 = vmatprep.subr.bf16.mxu0 %v4943_v4  ;;  %3533 = vmatprep.subr.bf16.mxu1 %v4945_v5  ;;  %v4949_v8 = vld [vmem:[#allocation5 + $0x44] ss:$16 sps:$4 sm:$0xff]   ;;  %v4951_v9 = vld [vmem:[#allocation5 + $0x4c] ss:$16 sps:$4 sm:$0xff]   ;;  %v4953_v10 = vld [vmem:[#allocation5 + $0x40] ss:$16 sps:$4 sm:$0xff]  }
  0x72   :  { %v4954_v11 = vld [vmem:[#allocation5 + $0x48] ss:$16 sps:$4 sm:$0xff]   ;;  %v4955_v12 = vld [vmem:[#allocation5 + $0x64] ss:$16 sps:$4 sm:$0xff]   ;;  %v4957_v13 = vld [vmem:[#allocation5 + $0x6c] ss:$16 sps:$4 sm:$0xff]  }
  0x73   :  { %v4959_v14 = vld [vmem:[#allocation5 + $0x60] ss:$16 sps:$4 sm:$0xff]   ;;  %v4960_v15 = vld [vmem:[#allocation5 + $0x68] ss:$16 sps:$4 sm:$0xff]   ;;  %v4961_v16 = vld [vmem:[#allocation5 + $0x84] ss:$16 sps:$4 sm:$0xff]  }
  0x74   :  { %3206 = vmatpush1.bf16.msra.mxu0 %v4947_v6  ;;  %3534 = vmatpush1.bf16.msra.mxu1 %v4948_v7  ;;  %v4963_v17 = vld [vmem:[#allocation5 + $0x8c] ss:$16 sps:$4 sm:$0xff]   ;;  %v4965_v18 = vld [vmem:[#allocation5 + $0x80] ss:$16 sps:$4 sm:$0xff]   ;;  %v4966_v19 = vld [vmem:[#allocation5 + $0x88] ss:$16 sps:$4 sm:$0xff]  }
  0x75   :  { %3207 = vmatprep.subr.bf16.mxu0 %v4949_v8  ;;  %3535 = vmatprep.subr.bf16.mxu1 %v4951_v9  ;;  %v4967_v20 = vld [vmem:[#allocation5 + $0xa4] ss:$16 sps:$4 sm:$0xff]   ;;  %v4969_v21 = vld [vmem:[#allocation5 + $0xac] ss:$16 sps:$4 sm:$0xff]   ;;  %v4971_v22 = vld [vmem:[#allocation5 + $0xa0] ss:$16 sps:$4 sm:$0xff]  }
  0x76   :  { %v4972_v23 = vld [vmem:[#allocation5 + $0xa8] ss:$16 sps:$4 sm:$0xff]   ;;  %v4973_v24 = vld [vmem:[#allocation5 + $0xc4] ss:$16 sps:$4 sm:$0xff]   ;;  %v4975_v25 = vld [vmem:[#allocation5 + $0xcc] ss:$16 sps:$4 sm:$0xff]  }
  0x77   :  { %v4977_v26 = vld [vmem:[#allocation5 + $0xc0] ss:$16 sps:$4 sm:$0xff]   ;;  %v4978_v27 = vld [vmem:[#allocation5 + $0xc8] ss:$16 sps:$4 sm:$0xff]   ;;  %v4979_v28 = vld [vmem:[#allocation5 + $0xe4] ss:$16 sps:$4 sm:$0xff]  }
  0x78   :  { %3208 = vmatpush1.bf16.msra.mxu0 %v4953_v10  ;;  %3536 = vmatpush1.bf16.msra.mxu1 %v4954_v11  ;;  %v4981_v29 = vld [vmem:[#allocation5 + $0xec] ss:$16 sps:$4 sm:$0xff]   ;;  %v4983_v30 = vld [vmem:[#allocation5 + $0xe0] ss:$16 sps:$4 sm:$0xff]   ;;  %v4984_v31 = vld [vmem:[#allocation5 + $0xe8] ss:$16 sps:$4 sm:$0xff]  }
  0x79   :  { %3209 = vmatprep.subr.bf16.mxu0 %v4955_v12  ;;  %3537 = vmatprep.subr.bf16.mxu1 %v4957_v13  ;;  %v4985_v32 = vld [vmem:[#allocation5 + $0x104] ss:$16 sps:$4 sm:$0xff]   ;;  %v4987_v33 = vld [vmem:[#allocation5 + $0x10c] ss:$16 sps:$4 sm:$0xff]   ;;  %v4989_v34 = vld [vmem:[#allocation5 + $0x100] ss:$16 sps:$4 sm:$0xff]  }
  0x7a   :  { %v4990_v35 = vld [vmem:[#allocation5 + $0x108] ss:$16 sps:$4 sm:$0xff]   ;;  %v4991_v36 = vld [vmem:[#allocation5 + $0x124] ss:$16 sps:$4 sm:$0xff]   ;;  %v4993_v37 = vld [vmem:[#allocation5 + $0x12c] ss:$16 sps:$4 sm:$0xff]  }
  0x7b   :  { %v4995_v38 = vld [vmem:[#allocation5 + $0x120] ss:$16 sps:$4 sm:$0xff]   ;;  %v4996_v39 = vld [vmem:[#allocation5 + $0x128] ss:$16 sps:$4 sm:$0xff]   ;;  %v4997_v40 = vld [vmem:[#allocation5 + $0x144] ss:$16 sps:$4 sm:$0xff]  }
  0x7c   :  { %3210 = vmatpush1.bf16.msra.mxu0 %v4959_v14  ;;  %3538 = vmatpush1.bf16.msra.mxu1 %v4960_v15  ;;  %v4999_v41 = vld [vmem:[#allocation5 + $0x14c] ss:$16 sps:$4 sm:$0xff]   ;;  %v5001_v42 = vld [vmem:[#allocation5 + $0x140] ss:$16 sps:$4 sm:$0xff]   ;;  %v5002_v43 = vld [vmem:[#allocation5 + $0x148] ss:$16 sps:$4 sm:$0xff]  }
  0x7d   :  { %3211 = vmatprep.subr.bf16.mxu0 %v4961_v16  ;;  %3539 = vmatprep.subr.bf16.mxu1 %v4963_v17  ;;  %v5003_v44 = vld [vmem:[#allocation5 + $0x164] ss:$16 sps:$4 sm:$0xff]   ;;  %v5005_v45 = vld [vmem:[#allocation5 + $0x16c] ss:$16 sps:$4 sm:$0xff]   ;;  %v5007_v47 = vld [vmem:[#allocation5 + $0x160] ss:$16 sps:$4 sm:$0xff]  }
  0x7e   :  { %v100_v46 = vld [vmem:[#allocation2 + $0x8] sm:$0xff]  ;;  %v5009_v50 = vld [vmem:[#allocation5 + $0x184] ss:$16 sps:$4 sm:$0xff]   ;;  %v5013_v52 = vld [vmem:[#allocation5 + $0x180] ss:$16 sps:$4 sm:$0xff]   ;;  %s5911_s5 = smov [#allocation13]  }
  0x7f   :  { %v116_v48 = vpack.c.bf16 %v100_v46, %v100_v46  ;;  %v5008_v49 = vld [vmem:[#allocation5 + $0x168] ss:$16 sps:$4 sm:$0xff]   ;;  %v5011_v51 = vld [vmem:[#allocation5 + $0x18c] ss:$16 sps:$4 sm:$0xff]   ;;  %v5015_v54 = vld [vmem:[#allocation5 + $0x1a4] ss:$16 sps:$4 sm:$0xff]  }
  0x80   :  { %3212 = vmatpush1.bf16.msra.mxu0 %v4965_v18  ;;  %3540 = vmatpush1.bf16.msra.mxu1 %v4966_v19  ;;  %v5014_v53 = vld [vmem:[#allocation5 + $0x188] ss:$16 sps:$4 sm:$0xff]   ;;  %v5017_v55 = vld [vmem:[#allocation5 + $0x1ac] ss:$16 sps:$4 sm:$0xff]   ;;  %v5019_v56 = vld [vmem:[#allocation5 + $0x1a0] ss:$16 sps:$4 sm:$0xff]  }
  0x81   :  { %3213 = vmatprep.subr.bf16.mxu0 %v4967_v20  ;;  %3541 = vmatprep.subr.bf16.mxu1 %v4969_v21  ;;  %v5020_v57 = vld [vmem:[#allocation5 + $0x1a8] ss:$16 sps:$4 sm:$0xff]   ;;  %v5021_v58 = vld [vmem:[#allocation5 + $0x1c4] ss:$16 sps:$4 sm:$0xff]   ;;  %v5023_v59 = vld [vmem:[#allocation5 + $0x1cc] ss:$16 sps:$4 sm:$0xff]  }
  0x82   :  { %3235 = vmatprep.mubr.bf16.mxu0 %v116_v48  ;;  %3563 = vmatprep.mubr.bf16.mxu1 %v116_v48  ;;  %v5025_v60 = vld [vmem:[#allocation5 + $0x1c0] ss:$16 sps:$4 sm:$0xff]   ;;  %v5026_v61 = vld [vmem:[#allocation5 + $0x1c8] ss:$16 sps:$4 sm:$0xff]   ;;  %v5027_v62 = vld [vmem:[#allocation5 + $0x1e4] ss:$16 sps:$4 sm:$0xff]  }
  0x83   :  { %v5029_v63 = vld [vmem:[#allocation5 + $0x1ec] ss:$16 sps:$4 sm:$0xff]   ;;  %v5031_v0 = vld [vmem:[#allocation5 + $0x1e0] ss:$16 sps:$4 sm:$0xff]   ;;  %v5032_v1 = vld [vmem:[#allocation5 + $0x1e8] ss:$16 sps:$4 sm:$0xff]  }
  0x84   :  { %3214 = vmatpush1.bf16.msra.mxu0 %v4971_v22  ;;  %3542 = vmatpush1.bf16.msra.mxu1 %v4972_v23  ;;  %v99_v2 = vld [vmem:[#allocation2] sm:$0xff]  ;;  %v5038_v4 = vld [vmem:[#allocation5 + $0x20c] ss:$16 sps:$4 sm:$0xff]   ;;  %v5036_v7 = vld [vmem:[#allocation5 + $0x208] ss:$16 sps:$4 sm:$0xff]   ;;  %s4269_s20 = sshll.u32 %s5911_s5, 4  ;;  %s4270_s20 = int_to_ptr.vmem [resolvable:$true] %s4269_s20 }
  0x85   :  { %3215 = vmatprep.subr.bf16.mxu0 %v4973_v24  ;;  %3543 = vmatprep.subr.bf16.mxu1 %v4975_v25  ;;  %v5035_v3 = vld [vmem:[#allocation5 + $0x204] ss:$16 sps:$4 sm:$0xff]   ;;  %v115_v5 = vpack.c.bf16 %v99_v2, %v99_v2  ;;  %v5033_v6 = vld [vmem:[#allocation5 + $0x200] ss:$16 sps:$4 sm:$0xff]   ;;  %v5044_v9 = vld [vmem:[#allocation5 + $0x22c] ss:$16 sps:$4 sm:$0xff]   ;;  %p5874_p7 = scmp.lt.s32.totalorder %s4270_s20, %s4270_s20 }
  0x86   :  { %v5041_v8 = vld [vmem:[#allocation5 + $0x224] ss:$16 sps:$4 sm:$0xff]   ;;  %v5039_v10 = vld [vmem:[#allocation5 + $0x220] ss:$16 sps:$4 sm:$0xff]   ;;  %v5042_v11 = vld [vmem:[#allocation5 + $0x228] ss:$16 sps:$4 sm:$0xff]  }
  0x87   :  { %v5047_v12 = vld [vmem:[#allocation5 + $0x244] ss:$16 sps:$4 sm:$0xff]   ;;  %v5050_v13 = vld [vmem:[#allocation5 + $0x24c] ss:$16 sps:$4 sm:$0xff]   ;;  %v5045_v14 = vld [vmem:[#allocation5 + $0x240] ss:$16 sps:$4 sm:$0xff]  }
  0x88   :  { %3216 = vmatpush1.bf16.msra.mxu0 %v4977_v26  ;;  %3544 = vmatpush1.bf16.msra.mxu1 %v4978_v27  ;;  %v5048_v15 = vld [vmem:[#allocation5 + $0x248] ss:$16 sps:$4 sm:$0xff]   ;;  %v5053_v16 = vld [vmem:[#allocation5 + $0x264] ss:$16 sps:$4 sm:$0xff]   ;;  %v5056_v17 = vld [vmem:[#allocation5 + $0x26c] ss:$16 sps:$4 sm:$0xff]  }
  0x89   :  { %3217 = vmatprep.subr.bf16.mxu0 %v4979_v28  ;;  %3545 = vmatprep.subr.bf16.mxu1 %v4981_v29  ;;  %v5051_v18 = vld [vmem:[#allocation5 + $0x260] ss:$16 sps:$4 sm:$0xff]   ;;  %v5054_v19 = vld [vmem:[#allocation5 + $0x268] ss:$16 sps:$4 sm:$0xff]   ;;  %v5059_v20 = vld [vmem:[#allocation5 + $0x284] ss:$16 sps:$4 sm:$0xff]  }
  0x8a   :  { %v5062_v21 = vld [vmem:[#allocation5 + $0x28c] ss:$16 sps:$4 sm:$0xff]   ;;  %v5057_v22 = vld [vmem:[#allocation5 + $0x280] ss:$16 sps:$4 sm:$0xff]   ;;  %v5060_v23 = vld [vmem:[#allocation5 + $0x288] ss:$16 sps:$4 sm:$0xff]  }
  0x8b   :  { %v5065_v24 = vld [vmem:[#allocation5 + $0x2a4] ss:$16 sps:$4 sm:$0xff]   ;;  %v5068_v25 = vld [vmem:[#allocation5 + $0x2ac] ss:$16 sps:$4 sm:$0xff]   ;;  %v5063_v26 = vld [vmem:[#allocation5 + $0x2a0] ss:$16 sps:$4 sm:$0xff]  }
  0x8c   :  { %3218 = vmatpush1.bf16.msra.mxu0 %v4983_v30  ;;  %3546 = vmatpush1.bf16.msra.mxu1 %v4984_v31  ;;  %v5066_v27 = vld [vmem:[#allocation5 + $0x2a8] ss:$16 sps:$4 sm:$0xff]   ;;  %v5071_v28 = vld [vmem:[#allocation5 + $0x2c4] ss:$16 sps:$4 sm:$0xff]   ;;  %v5074_v29 = vld [vmem:[#allocation5 + $0x2cc] ss:$16 sps:$4 sm:$0xff]  }
  0x8d   :  { %3219 = vmatprep.subr.bf16.mxu0 %v4985_v32  ;;  %3547 = vmatprep.subr.bf16.mxu1 %v4987_v33  ;;  %v102_v30 = vld [vmem:[#allocation2 + $0x18] sm:$0xff]  ;;  %v5069_v31 = vld [vmem:[#allocation5 + $0x2c0] ss:$16 sps:$4 sm:$0xff]   ;;  %v5095_v46 = vld [vmem:[#allocation5 + $0x344] ss:$16 sps:$4 sm:$0xff]   ;;  %s5869_s0 = scalar_lea.vmem %s4270_s20, 128 }
  0x8e   :  { %v118_v32 = vpack.c.bf16 %v102_v30, %v102_v30  ;;  %v5072_v33 = vld [vmem:[#allocation5 + $0x2c8] ss:$16 sps:$4 sm:$0xff]   ;;  %v5093_v48 = vld [vmem:[#allocation5 + $0x340] ss:$16 sps:$4 sm:$0xff]   ;;  %v5125_v2 = vld [vmem:[#allocation5 + $0x3e4] ss:$16 sps:$4 sm:$0xff]   ;;  %p5870_p6 = scmp.ne.s32.totalorder %s4270_s20, %s5869_s0  ;;  %p5875_p8 = scmp.lt.s32.totalorder %s5869_s0, %s5869_s0 }
  0x8f   :  { %v5161_v30 = vld [vmem:[#allocation5 + $0x4a4] ss:$16 sps:$4 sm:$0xff]  }
  0x90   :  { %3220 = vmatpush1.bf16.msra.mxu0 %v4989_v34  ;;  %3548 = vmatpush1.bf16.msra.mxu1 %v4990_v35  ;;  %v5077_v34 = vld [vmem:[#allocation5 + $0x2e4] ss:$16 sps:$4 sm:$0xff]   ;;  %v5080_v35 = vld [vmem:[#allocation5 + $0x2ec] ss:$16 sps:$4 sm:$0xff]   ;;  %p5876_p9 = por %p5875_p8, %p5874_p7 }
  0x91   :  { %3221 = vmatprep.subr.bf16.mxu0 %v4991_v36  ;;  %3549 = vmatprep.subr.bf16.mxu1 %v4993_v37  ;;  %v5075_v36 = vld [vmem:[#allocation5 + $0x2e0] ss:$16 sps:$4 sm:$0xff]   ;;  %v5078_v37 = vld [vmem:[#allocation5 + $0x2e8] ss:$16 sps:$4 sm:$0xff]  }
  0x92   :  { %p5877_p10 = pnand %p5876_p9, %p5870_p6 }
  0x94   :  { %3222 = vmatpush1.bf16.msra.mxu0 %v4995_v38  ;;  %3550 = vmatpush1.bf16.msra.mxu1 %v4996_v39  ;;  %v5083_v38 = vld [vmem:[#allocation5 + $0x304] ss:$16 sps:$4 sm:$0xff]   ;;  %v5086_v39 = vld [vmem:[#allocation5 + $0x30c] ss:$16 sps:$4 sm:$0xff]  }
  0x95   :  { %3223 = vmatprep.subr.bf16.mxu0 %v4997_v40  ;;  %3551 = vmatprep.subr.bf16.mxu1 %v4999_v41  ;;  %v5081_v40 = vld [vmem:[#allocation5 + $0x300] ss:$16 sps:$4 sm:$0xff]   ;;  %v5084_v41 = vld [vmem:[#allocation5 + $0x308] ss:$16 sps:$4 sm:$0xff]  }
  0x98   :  { %3224 = vmatpush1.bf16.msra.mxu0 %v5001_v42  ;;  %3552 = vmatpush1.bf16.msra.mxu1 %v5002_v43  ;;  %v5089_v42 = vld [vmem:[#allocation5 + $0x324] ss:$16 sps:$4 sm:$0xff]   ;;  %v5092_v43 = vld [vmem:[#allocation5 + $0x32c] ss:$16 sps:$4 sm:$0xff]  }
  0x99   :  { %3225 = vmatprep.subr.bf16.mxu0 %v5003_v44  ;;  %3553 = vmatprep.subr.bf16.mxu1 %v5005_v45  ;;  %v5087_v44 = vld [vmem:[#allocation5 + $0x320] ss:$16 sps:$4 sm:$0xff]   ;;  %v5090_v45 = vld [vmem:[#allocation5 + $0x328] ss:$16 sps:$4 sm:$0xff]  }
  0x9c   :  { %3226 = vmatpush1.bf16.msra.mxu0 %v5007_v47  ;;  %3554 = vmatpush1.bf16.msra.mxu1 %v5008_v49  ;;  %v5098_v47 = vld [vmem:[#allocation5 + $0x34c] ss:$16 sps:$4 sm:$0xff]   ;;  %v5096_v49 = vld [vmem:[#allocation5 + $0x348] ss:$16 sps:$4 sm:$0xff]  }
  0x9d   :  { %3227 = vmatprep.subr.bf16.mxu0 %v5009_v50  ;;  %3555 = vmatprep.subr.bf16.mxu1 %v5011_v51  ;;  %v5101_v50 = vld [vmem:[#allocation5 + $0x364] ss:$16 sps:$4 sm:$0xff]   ;;  %v5104_v51 = vld [vmem:[#allocation5 + $0x36c] ss:$16 sps:$4 sm:$0xff]  }
  0xa0   :  { %3228 = vmatpush1.bf16.msra.mxu0 %v5013_v52  ;;  %3556 = vmatpush1.bf16.msra.mxu1 %v5014_v53  ;;  %v5099_v52 = vld [vmem:[#allocation5 + $0x360] ss:$16 sps:$4 sm:$0xff]   ;;  %v5102_v53 = vld [vmem:[#allocation5 + $0x368] ss:$16 sps:$4 sm:$0xff]  }
  0xa1   :  { %3229 = vmatprep.subr.bf16.mxu0 %v5015_v54  ;;  %3557 = vmatprep.subr.bf16.mxu1 %v5017_v55  ;;  %v5107_v54 = vld [vmem:[#allocation5 + $0x384] ss:$16 sps:$4 sm:$0xff]   ;;  %v5110_v55 = vld [vmem:[#allocation5 + $0x38c] ss:$16 sps:$4 sm:$0xff]  }
  0xa4   :  { %3230 = vmatpush1.bf16.msra.mxu0 %v5019_v56  ;;  %3558 = vmatpush1.bf16.msra.mxu1 %v5020_v57  ;;  %v5105_v56 = vld [vmem:[#allocation5 + $0x380] ss:$16 sps:$4 sm:$0xff]   ;;  %v5108_v57 = vld [vmem:[#allocation5 + $0x388] ss:$16 sps:$4 sm:$0xff]  }
  0xa5   :  { %3231 = vmatprep.subr.bf16.mxu0 %v5021_v58  ;;  %3559 = vmatprep.subr.bf16.mxu1 %v5023_v59  ;;  %v5113_v58 = vld [vmem:[#allocation5 + $0x3a4] ss:$16 sps:$4 sm:$0xff]   ;;  %v5116_v59 = vld [vmem:[#allocation5 + $0x3ac] ss:$16 sps:$4 sm:$0xff]  }
  0xa8   :  { %3232 = vmatpush1.bf16.msra.mxu0 %v5025_v60  ;;  %3560 = vmatpush1.bf16.msra.mxu1 %v5026_v61  ;;  %v5111_v60 = vld [vmem:[#allocation5 + $0x3a0] ss:$16 sps:$4 sm:$0xff]   ;;  %v5114_v61 = vld [vmem:[#allocation5 + $0x3a8] ss:$16 sps:$4 sm:$0xff]  }
  0xa9   :  { %3233 = vmatprep.subr.bf16.mxu0 %v5027_v62  ;;  %3561 = vmatprep.subr.bf16.mxu1 %v5029_v63  ;;  %v5119_v62 = vld [vmem:[#allocation5 + $0x3c4] ss:$16 sps:$4 sm:$0xff]   ;;  %v5122_v63 = vld [vmem:[#allocation5 + $0x3cc] ss:$16 sps:$4 sm:$0xff]  }
  0xac   :  { %3234 = vmatpush1.bf16.msra.mxu0 %v5031_v0  ;;  %3562 = vmatpush1.bf16.msra.mxu1 %v5032_v1  ;;  %v5117_v0 = vld [vmem:[#allocation5 + $0x3c0] ss:$16 sps:$4 sm:$0xff]   ;;  %v5120_v1 = vld [vmem:[#allocation5 + $0x3c8] ss:$16 sps:$4 sm:$0xff]  }
  0xad   :  { %3244 = vmatprep.subr.bf16.mxu0 %v5035_v3  ;;  %3572 = vmatprep.subr.bf16.mxu1 %v5038_v4  ;;  %v5128_v3 = vld [vmem:[#allocation5 + $0x3ec] ss:$16 sps:$4 sm:$0xff]   ;;  %v5123_v4 = vld [vmem:[#allocation5 + $0x3e0] ss:$16 sps:$4 sm:$0xff]  }
  0xaf   :  { %3236 = vmatmul.mubr.bf16.vlgmr.msra.gmra.mrb[0].mxu0 %v115_v5  ;;  %3564 = vmatmul.mubr.bf16.vlgmr.msra.gmra.mrb[0].mxu1 %v115_v5  ;;  %v5126_v5 = vld [vmem:[#allocation5 + $0x3e8] ss:$16 sps:$4 sm:$0xff]  }
  0xb0   :  { %3245 = vmatpush1.bf16.msra.mxu0 %v5033_v6  ;;  %3573 = vmatpush1.bf16.msra.mxu1 %v5036_v7  ;;  %v5131_v6 = vld [vmem:[#allocation5 + $0x404] ss:$16 sps:$4 sm:$0xff]  }
  0xb1   :  { %3246 = vmatprep.subr.bf16.mxu0 %v5041_v8  ;;  %3574 = vmatprep.subr.bf16.mxu1 %v5044_v9  ;;  %v101_v7 = vld [vmem:[#allocation2 + $0x10] sm:$0xff]  ;;  %v5134_v8 = vld [vmem:[#allocation5 + $0x40c] ss:$16 sps:$4 sm:$0xff]  }
  0xb2   :  { %3276 = vmatprep.mubr.bf16.mxu0 %v118_v32  ;;  %3604 = vmatprep.mubr.bf16.mxu1 %v118_v32  ;;  %v5129_v9 = vld [vmem:[#allocation5 + $0x400] ss:$16 sps:$4 sm:$0xff]  }
  0xb3   :  { %v5159_v32 = vld [vmem:[#allocation5 + $0x4a0] ss:$16 sps:$4 sm:$0xff]  }
  0xb4   :  { %3247 = vmatpush1.bf16.msra.mxu0 %v5039_v10  ;;  %3575 = vmatpush1.bf16.msra.mxu1 %v5042_v11  ;;  %v5132_v10 = vld [vmem:[#allocation5 + $0x408] ss:$16 sps:$4 sm:$0xff]   ;;  %v117_v11 = vpack.c.bf16 %v101_v7, %v101_v7  ;;  %v5224_v7 = vld [vmem:[#allocation5 + $0x5ec] ss:$16 sps:$4 sm:$0xff]  }
  0xb5   :  { %3248 = vmatprep.subr.bf16.mxu0 %v5047_v12  ;;  %3576 = vmatprep.subr.bf16.mxu1 %v5050_v13  ;;  %v5137_v12 = vld [vmem:[#allocation5 + $0x424] ss:$16 sps:$4 sm:$0xff]   ;;  %v5140_v13 = vld [vmem:[#allocation5 + $0x42c] ss:$16 sps:$4 sm:$0xff]  }
  0xb8   :  { %3249 = vmatpush1.bf16.msra.mxu0 %v5045_v14  ;;  %3577 = vmatpush1.bf16.msra.mxu1 %v5048_v15  ;;  %v104_v14 = vld [vmem:[#allocation2 + $0x28] sm:$0xff] }
  0xb9   :  { %3250 = vmatprep.subr.bf16.mxu0 %v5053_v16  ;;  %3578 = vmatprep.subr.bf16.mxu1 %v5056_v17  ;;  %v120_v15 = vpack.c.bf16 %v104_v14, %v104_v14  ;;  %v5135_v16 = vld [vmem:[#allocation5 + $0x420] ss:$16 sps:$4 sm:$0xff]   ;;  %v5138_v17 = vld [vmem:[#allocation5 + $0x428] ss:$16 sps:$4 sm:$0xff]  }
  0xba   :  { %v5228_v14 = vld [vmem:[#allocation5 + $0x608] ss:$16 sps:$4 sm:$0xff]  }
  0xbc   :  { %3251 = vmatpush1.bf16.msra.mxu0 %v5051_v18  ;;  %3579 = vmatpush1.bf16.msra.mxu1 %v5054_v19  ;;  %v5143_v18 = vld [vmem:[#allocation5 + $0x444] ss:$16 sps:$4 sm:$0xff]   ;;  %v5146_v19 = vld [vmem:[#allocation5 + $0x44c] ss:$16 sps:$4 sm:$0xff]  }
  0xbd   :  { %3252 = vmatprep.subr.bf16.mxu0 %v5059_v20  ;;  %3580 = vmatprep.subr.bf16.mxu1 %v5062_v21  ;;  %v5141_v20 = vld [vmem:[#allocation5 + $0x440] ss:$16 sps:$4 sm:$0xff]   ;;  %v5144_v21 = vld [vmem:[#allocation5 + $0x448] ss:$16 sps:$4 sm:$0xff]  }
  0xc0   :  { %3253 = vmatpush1.bf16.msra.mxu0 %v5057_v22  ;;  %3581 = vmatpush1.bf16.msra.mxu1 %v5060_v23  ;;  %v5149_v22 = vld [vmem:[#allocation5 + $0x464] ss:$16 sps:$4 sm:$0xff]   ;;  %v5152_v23 = vld [vmem:[#allocation5 + $0x46c] ss:$16 sps:$4 sm:$0xff]  }
  0xc1   :  { %3254 = vmatprep.subr.bf16.mxu0 %v5065_v24  ;;  %3582 = vmatprep.subr.bf16.mxu1 %v5068_v25  ;;  %v5147_v24 = vld [vmem:[#allocation5 + $0x460] ss:$16 sps:$4 sm:$0xff]   ;;  %v5150_v25 = vld [vmem:[#allocation5 + $0x468] ss:$16 sps:$4 sm:$0xff]  }
  0xc4   :  { %3255 = vmatpush1.bf16.msra.mxu0 %v5063_v26  ;;  %3583 = vmatpush1.bf16.msra.mxu1 %v5066_v27  ;;  %v5155_v26 = vld [vmem:[#allocation5 + $0x484] ss:$16 sps:$4 sm:$0xff]   ;;  %v5158_v27 = vld [vmem:[#allocation5 + $0x48c] ss:$16 sps:$4 sm:$0xff]  }
  0xc5   :  { %3256 = vmatprep.subr.bf16.mxu0 %v5071_v28  ;;  %3584 = vmatprep.subr.bf16.mxu1 %v5074_v29  ;;  %v5153_v28 = vld [vmem:[#allocation5 + $0x480] ss:$16 sps:$4 sm:$0xff]   ;;  %v5156_v29 = vld [vmem:[#allocation5 + $0x488] ss:$16 sps:$4 sm:$0xff]  }
  0xc8   :  { %3257 = vmatpush1.bf16.msra.mxu0 %v5069_v31  ;;  %3585 = vmatpush1.bf16.msra.mxu1 %v5072_v33  ;;  %v5164_v31 = vld [vmem:[#allocation5 + $0x4ac] ss:$16 sps:$4 sm:$0xff]   ;;  %v5162_v33 = vld [vmem:[#allocation5 + $0x4a8] ss:$16 sps:$4 sm:$0xff]  }
  0xc9   :  { %3258 = vmatprep.subr.bf16.mxu0 %v5077_v34  ;;  %3586 = vmatprep.subr.bf16.mxu1 %v5080_v35  ;;  %v5167_v34 = vld [vmem:[#allocation5 + $0x4c4] ss:$16 sps:$4 sm:$0xff]   ;;  %v5170_v35 = vld [vmem:[#allocation5 + $0x4cc] ss:$16 sps:$4 sm:$0xff]  }
  0xcc   :  { %3259 = vmatpush1.bf16.msra.mxu0 %v5075_v36  ;;  %3587 = vmatpush1.bf16.msra.mxu1 %v5078_v37  ;;  %v5165_v36 = vld [vmem:[#allocation5 + $0x4c0] ss:$16 sps:$4 sm:$0xff]   ;;  %v5168_v37 = vld [vmem:[#allocation5 + $0x4c8] ss:$16 sps:$4 sm:$0xff]  }
  0xcd   :  { %3260 = vmatprep.subr.bf16.mxu0 %v5083_v38  ;;  %3588 = vmatprep.subr.bf16.mxu1 %v5086_v39  ;;  %v5173_v38 = vld [vmem:[#allocation5 + $0x4e4] ss:$16 sps:$4 sm:$0xff]   ;;  %v5176_v39 = vld [vmem:[#allocation5 + $0x4ec] ss:$16 sps:$4 sm:$0xff]  }
  0xd0   :  { %3261 = vmatpush1.bf16.msra.mxu0 %v5081_v40  ;;  %3589 = vmatpush1.bf16.msra.mxu1 %v5084_v41  ;;  %v5171_v40 = vld [vmem:[#allocation5 + $0x4e0] ss:$16 sps:$4 sm:$0xff]   ;;  %v5174_v41 = vld [vmem:[#allocation5 + $0x4e8] ss:$16 sps:$4 sm:$0xff]  }
  0xd1   :  { %3262 = vmatprep.subr.bf16.mxu0 %v5089_v42  ;;  %3590 = vmatprep.subr.bf16.mxu1 %v5092_v43  ;;  %v5179_v42 = vld [vmem:[#allocation5 + $0x504] ss:$16 sps:$4 sm:$0xff]   ;;  %v5182_v43 = vld [vmem:[#allocation5 + $0x50c] ss:$16 sps:$4 sm:$0xff]  }
  0xd4   :  { %3263 = vmatpush1.bf16.msra.mxu0 %v5087_v44  ;;  %3591 = vmatpush1.bf16.msra.mxu1 %v5090_v45  ;;  %v5177_v44 = vld [vmem:[#allocation5 + $0x500] ss:$16 sps:$4 sm:$0xff]   ;;  %v5180_v45 = vld [vmem:[#allocation5 + $0x508] ss:$16 sps:$4 sm:$0xff]  }
  0xd5   :  { %3264 = vmatprep.subr.bf16.mxu0 %v5095_v46  ;;  %3592 = vmatprep.subr.bf16.mxu1 %v5098_v47  ;;  %v5185_v46 = vld [vmem:[#allocation5 + $0x524] ss:$16 sps:$4 sm:$0xff]   ;;  %v5188_v47 = vld [vmem:[#allocation5 + $0x52c] ss:$16 sps:$4 sm:$0xff]  }
  0xd8   :  { %3265 = vmatpush1.bf16.msra.mxu0 %v5093_v48  ;;  %3593 = vmatpush1.bf16.msra.mxu1 %v5096_v49  ;;  %v5183_v48 = vld [vmem:[#allocation5 + $0x520] ss:$16 sps:$4 sm:$0xff]   ;;  %v5186_v49 = vld [vmem:[#allocation5 + $0x528] ss:$16 sps:$4 sm:$0xff]  }
  0xd9   :  { %3266 = vmatprep.subr.bf16.mxu0 %v5101_v50  ;;  %3594 = vmatprep.subr.bf16.mxu1 %v5104_v51  ;;  %v5191_v50 = vld [vmem:[#allocation5 + $0x544] ss:$16 sps:$4 sm:$0xff]   ;;  %v5194_v51 = vld [vmem:[#allocation5 + $0x54c] ss:$16 sps:$4 sm:$0xff]  }
  0xdc   :  { %3267 = vmatpush1.bf16.msra.mxu0 %v5099_v52  ;;  %3595 = vmatpush1.bf16.msra.mxu1 %v5102_v53  ;;  %v5189_v52 = vld [vmem:[#allocation5 + $0x540] ss:$16 sps:$4 sm:$0xff]   ;;  %v5192_v53 = vld [vmem:[#allocation5 + $0x548] ss:$16 sps:$4 sm:$0xff]  }
  0xdd   :  { %3268 = vmatprep.subr.bf16.mxu0 %v5107_v54  ;;  %3596 = vmatprep.subr.bf16.mxu1 %v5110_v55  ;;  %v5197_v54 = vld [vmem:[#allocation5 + $0x564] ss:$16 sps:$4 sm:$0xff]   ;;  %v5200_v55 = vld [vmem:[#allocation5 + $0x56c] ss:$16 sps:$4 sm:$0xff]  }
  0xe0   :  { %3269 = vmatpush1.bf16.msra.mxu0 %v5105_v56  ;;  %3597 = vmatpush1.bf16.msra.mxu1 %v5108_v57  ;;  %v5195_v56 = vld [vmem:[#allocation5 + $0x560] ss:$16 sps:$4 sm:$0xff]   ;;  %v5198_v57 = vld [vmem:[#allocation5 + $0x568] ss:$16 sps:$4 sm:$0xff]  }
  0xe1   :  { %3270 = vmatprep.subr.bf16.mxu0 %v5113_v58  ;;  %3598 = vmatprep.subr.bf16.mxu1 %v5116_v59  ;;  %v5203_v58 = vld [vmem:[#allocation5 + $0x584] ss:$16 sps:$4 sm:$0xff]   ;;  %v5206_v59 = vld [vmem:[#allocation5 + $0x58c] ss:$16 sps:$4 sm:$0xff]  }
  0xe4   :  { %3271 = vmatpush1.bf16.msra.mxu0 %v5111_v60  ;;  %3599 = vmatpush1.bf16.msra.mxu1 %v5114_v61  ;;  %v5201_v60 = vld [vmem:[#allocation5 + $0x580] ss:$16 sps:$4 sm:$0xff]   ;;  %v5204_v61 = vld [vmem:[#allocation5 + $0x588] ss:$16 sps:$4 sm:$0xff]  }
  0xe5   :  { %3272 = vmatprep.subr.bf16.mxu0 %v5119_v62  ;;  %3600 = vmatprep.subr.bf16.mxu1 %v5122_v63  ;;  %v5209_v62 = vld [vmem:[#allocation5 + $0x5a4] ss:$16 sps:$4 sm:$0xff]   ;;  %v5212_v63 = vld [vmem:[#allocation5 + $0x5ac] ss:$16 sps:$4 sm:$0xff]  }
  0xe8   :  { %3273 = vmatpush1.bf16.msra.mxu0 %v5117_v0  ;;  %3601 = vmatpush1.bf16.msra.mxu1 %v5120_v1  ;;  %v5207_v0 = vld [vmem:[#allocation5 + $0x5a0] ss:$16 sps:$4 sm:$0xff]   ;;  %v5210_v1 = vld [vmem:[#allocation5 + $0x5a8] ss:$16 sps:$4 sm:$0xff]  }
  0xe9   :  { %3274 = vmatprep.subr.bf16.mxu0 %v5125_v2  ;;  %3602 = vmatprep.subr.bf16.mxu1 %v5128_v3  ;;  %v5215_v2 = vld [vmem:[#allocation5 + $0x5c4] ss:$16 sps:$4 sm:$0xff]   ;;  %v5218_v3 = vld [vmem:[#allocation5 + $0x5cc] ss:$16 sps:$4 sm:$0xff]  }
  0xec   :  { %3275 = vmatpush1.bf16.msra.mxu0 %v5123_v4  ;;  %3603 = vmatpush1.bf16.msra.mxu1 %v5126_v5  ;;  %v5213_v4 = vld [vmem:[#allocation5 + $0x5c0] ss:$16 sps:$4 sm:$0xff]   ;;  %v5216_v5 = vld [vmem:[#allocation5 + $0x5c8] ss:$16 sps:$4 sm:$0xff]  }
  0xed   :  { %3285 = vmatprep.subr.bf16.mxu0 %v5131_v6  ;;  %3613 = vmatprep.subr.bf16.mxu1 %v5134_v8  ;;  %v5221_v6 = vld [vmem:[#allocation5 + $0x5e4] ss:$16 sps:$4 sm:$0xff]   ;;  %v5219_v8 = vld [vmem:[#allocation5 + $0x5e0] ss:$16 sps:$4 sm:$0xff]  }
  0xef   :  { %3277 = vmatmul.mubr.bf16.vlgmr.msra.gmra.mrb[0].mxu0 %v117_v11  ;;  %3605 = vmatmul.mubr.bf16.vlgmr.msra.gmra.mrb[0].mxu1 %v117_v11  ;;  %v103_v11 = vld [vmem:[#allocation2 + $0x20] sm:$0xff] }
  0xf0   :  { %3286 = vmatpush1.bf16.msra.mxu0 %v5129_v9  ;;  %3614 = vmatpush1.bf16.msra.mxu1 %v5132_v10  ;;  %v5222_v9 = vld [vmem:[#allocation5 + $0x5e8] ss:$16 sps:$4 sm:$0xff]   ;;  %v5227_v10 = vld [vmem:[#allocation5 + $0x604] ss:$16 sps:$4 sm:$0xff]  }
  0xf1   :  { %3287 = vmatprep.subr.bf16.mxu0 %v5137_v12  ;;  %3615 = vmatprep.subr.bf16.mxu1 %v5140_v13  ;;  %v5230_v12 = vld [vmem:[#allocation5 + $0x60c] ss:$16 sps:$4 sm:$0xff]   ;;  %v5225_v13 = vld [vmem:[#allocation5 + $0x600] ss:$16 sps:$4 sm:$0xff]  }
  0xf2   :  { %3317 = vmatprep.mubr.bf16.mxu0 %v120_v15  ;;  %3645 = vmatprep.mubr.bf16.mxu1 %v120_v15  ;;  %v119_v15 = vpack.c.bf16 %v103_v11, %v103_v11  ;;  %v5320_v11 = vld [vmem:[#allocation5 + $0x7ec] ss:$16 sps:$4 sm:$0xff]  }
  0xf4   :  { %3288 = vmatpush1.bf16.msra.mxu0 %v5135_v16  ;;  %3616 = vmatpush1.bf16.msra.mxu1 %v5138_v17  ;;  %v106_v16 = vld [vmem:[#allocation2 + $0x38] sm:$0xff]  ;;  %v5233_v17 = vld [vmem:[#allocation5 + $0x624] ss:$16 sps:$4 sm:$0xff]  }
  0xf5   :  { %3289 = vmatprep.subr.bf16.mxu0 %v5143_v18  ;;  %3617 = vmatprep.subr.bf16.mxu1 %v5146_v19  ;;  %v5236_v18 = vld [vmem:[#allocation5 + $0x62c] ss:$16 sps:$4 sm:$0xff]   ;;  %v122_v19 = vpack.c.bf16 %v106_v16, %v106_v16 }
  0xf6   :  { %v5326_v16 = vld [vmem:[#allocation5 + $0x80c] ss:$16 sps:$4 sm:$0xff]  }
  0xf8   :  { %3290 = vmatpush1.bf16.msra.mxu0 %v5141_v20  ;;  %3618 = vmatpush1.bf16.msra.mxu1 %v5144_v21  ;;  %v5231_v20 = vld [vmem:[#allocation5 + $0x620] ss:$16 sps:$4 sm:$0xff]   ;;  %v5234_v21 = vld [vmem:[#allocation5 + $0x628] ss:$16 sps:$4 sm:$0xff]  }
  0xf9   :  { %3291 = vmatprep.subr.bf16.mxu0 %v5149_v22  ;;  %3619 = vmatprep.subr.bf16.mxu1 %v5152_v23  ;;  %v5239_v22 = vld [vmem:[#allocation5 + $0x644] ss:$16 sps:$4 sm:$0xff]   ;;  %v5242_v23 = vld [vmem:[#allocation5 + $0x64c] ss:$16 sps:$4 sm:$0xff]  }
  0xfc   :  { %3292 = vmatpush1.bf16.msra.mxu0 %v5147_v24  ;;  %3620 = vmatpush1.bf16.msra.mxu1 %v5150_v25  ;;  %v5237_v24 = vld [vmem:[#allocation5 + $0x640] ss:$16 sps:$4 sm:$0xff]   ;;  %v5240_v25 = vld [vmem:[#allocation5 + $0x648] ss:$16 sps:$4 sm:$0xff]  }
  0xfd   :  { %3293 = vmatprep.subr.bf16.mxu0 %v5155_v26  ;;  %3621 = vmatprep.subr.bf16.mxu1 %v5158_v27  ;;  %v5245_v26 = vld [vmem:[#allocation5 + $0x664] ss:$16 sps:$4 sm:$0xff]   ;;  %v5248_v27 = vld [vmem:[#allocation5 + $0x66c] ss:$16 sps:$4 sm:$0xff]  }
 0x100   :  { %3294 = vmatpush1.bf16.msra.mxu0 %v5153_v28  ;;  %3622 = vmatpush1.bf16.msra.mxu1 %v5156_v29  ;;  %v5243_v28 = vld [vmem:[#allocation5 + $0x660] ss:$16 sps:$4 sm:$0xff]   ;;  %v5246_v29 = vld [vmem:[#allocation5 + $0x668] ss:$16 sps:$4 sm:$0xff]  }
 0x101   :  { %3295 = vmatprep.subr.bf16.mxu0 %v5161_v30  ;;  %3623 = vmatprep.subr.bf16.mxu1 %v5164_v31  ;;  %v5251_v30 = vld [vmem:[#allocation5 + $0x684] ss:$16 sps:$4 sm:$0xff]   ;;  %v5254_v31 = vld [vmem:[#allocation5 + $0x68c] ss:$16 sps:$4 sm:$0xff]  }
 0x104   :  { %3296 = vmatpush1.bf16.msra.mxu0 %v5159_v32  ;;  %3624 = vmatpush1.bf16.msra.mxu1 %v5162_v33  ;;  %v5249_v32 = vld [vmem:[#allocation5 + $0x680] ss:$16 sps:$4 sm:$0xff]   ;;  %v5252_v33 = vld [vmem:[#allocation5 + $0x688] ss:$16 sps:$4 sm:$0xff]  }
 0x105   :  { %3297 = vmatprep.subr.bf16.mxu0 %v5167_v34  ;;  %3625 = vmatprep.subr.bf16.mxu1 %v5170_v35  ;;  %v5257_v34 = vld [vmem:[#allocation5 + $0x6a4] ss:$16 sps:$4 sm:$0xff]   ;;  %v5260_v35 = vld [vmem:[#allocation5 + $0x6ac] ss:$16 sps:$4 sm:$0xff]  }
 0x108   :  { %3298 = vmatpush1.bf16.msra.mxu0 %v5165_v36  ;;  %3626 = vmatpush1.bf16.msra.mxu1 %v5168_v37  ;;  %v5255_v36 = vld [vmem:[#allocation5 + $0x6a0] ss:$16 sps:$4 sm:$0xff]   ;;  %v5258_v37 = vld [vmem:[#allocation5 + $0x6a8] ss:$16 sps:$4 sm:$0xff]  }
 0x109   :  { %3299 = vmatprep.subr.bf16.mxu0 %v5173_v38  ;;  %3627 = vmatprep.subr.bf16.mxu1 %v5176_v39  ;;  %v5263_v38 = vld [vmem:[#allocation5 + $0x6c4] ss:$16 sps:$4 sm:$0xff]   ;;  %v5266_v39 = vld [vmem:[#allocation5 + $0x6cc] ss:$16 sps:$4 sm:$0xff]  }
 0x10c   :  { %3300 = vmatpush1.bf16.msra.mxu0 %v5171_v40  ;;  %3628 = vmatpush1.bf16.msra.mxu1 %v5174_v41  ;;  %v5261_v40 = vld [vmem:[#allocation5 + $0x6c0] ss:$16 sps:$4 sm:$0xff]   ;;  %v5264_v41 = vld [vmem:[#allocation5 + $0x6c8] ss:$16 sps:$4 sm:$0xff]  }
 0x10d   :  { %3301 = vmatprep.subr.bf16.mxu0 %v5179_v42  ;;  %3629 = vmatprep.subr.bf16.mxu1 %v5182_v43  ;;  %v5269_v42 = vld [vmem:[#allocation5 + $0x6e4] ss:$16 sps:$4 sm:$0xff]   ;;  %v5272_v43 = vld [vmem:[#allocation5 + $0x6ec] ss:$16 sps:$4 sm:$0xff]  }
 0x110   :  { %3302 = vmatpush1.bf16.msra.mxu0 %v5177_v44  ;;  %3630 = vmatpush1.bf16.msra.mxu1 %v5180_v45  ;;  %v5267_v44 = vld [vmem:[#allocation5 + $0x6e0] ss:$16 sps:$4 sm:$0xff]   ;;  %v5270_v45 = vld [vmem:[#allocation5 + $0x6e8] ss:$16 sps:$4 sm:$0xff]  }
 0x111   :  { %3303 = vmatprep.subr.bf16.mxu0 %v5185_v46  ;;  %3631 = vmatprep.subr.bf16.mxu1 %v5188_v47  ;;  %v5275_v46 = vld [vmem:[#allocation5 + $0x704] ss:$16 sps:$4 sm:$0xff]   ;;  %v5278_v47 = vld [vmem:[#allocation5 + $0x70c] ss:$16 sps:$4 sm:$0xff]  }
 0x114   :  { %3304 = vmatpush1.bf16.msra.mxu0 %v5183_v48  ;;  %3632 = vmatpush1.bf16.msra.mxu1 %v5186_v49  ;;  %v5273_v48 = vld [vmem:[#allocation5 + $0x700] ss:$16 sps:$4 sm:$0xff]   ;;  %v5276_v49 = vld [vmem:[#allocation5 + $0x708] ss:$16 sps:$4 sm:$0xff]  }
 0x115   :  { %3305 = vmatprep.subr.bf16.mxu0 %v5191_v50  ;;  %3633 = vmatprep.subr.bf16.mxu1 %v5194_v51  ;;  %v5281_v50 = vld [vmem:[#allocation5 + $0x724] ss:$16 sps:$4 sm:$0xff]   ;;  %v5284_v51 = vld [vmem:[#allocation5 + $0x72c] ss:$16 sps:$4 sm:$0xff]  }
 0x118   :  { %3306 = vmatpush1.bf16.msra.mxu0 %v5189_v52  ;;  %3634 = vmatpush1.bf16.msra.mxu1 %v5192_v53  ;;  %v5279_v52 = vld [vmem:[#allocation5 + $0x720] ss:$16 sps:$4 sm:$0xff]   ;;  %v5282_v53 = vld [vmem:[#allocation5 + $0x728] ss:$16 sps:$4 sm:$0xff]  }
 0x119   :  { %3307 = vmatprep.subr.bf16.mxu0 %v5197_v54  ;;  %3635 = vmatprep.subr.bf16.mxu1 %v5200_v55  ;;  %v5287_v54 = vld [vmem:[#allocation5 + $0x744] ss:$16 sps:$4 sm:$0xff]   ;;  %v5290_v55 = vld [vmem:[#allocation5 + $0x74c] ss:$16 sps:$4 sm:$0xff]  }
 0x11c   :  { %3308 = vmatpush1.bf16.msra.mxu0 %v5195_v56  ;;  %3636 = vmatpush1.bf16.msra.mxu1 %v5198_v57  ;;  %v5285_v56 = vld [vmem:[#allocation5 + $0x740] ss:$16 sps:$4 sm:$0xff]   ;;  %v5288_v57 = vld [vmem:[#allocation5 + $0x748] ss:$16 sps:$4 sm:$0xff]  }
 0x11d   :  { %3309 = vmatprep.subr.bf16.mxu0 %v5203_v58  ;;  %3637 = vmatprep.subr.bf16.mxu1 %v5206_v59  ;;  %v5293_v58 = vld [vmem:[#allocation5 + $0x764] ss:$16 sps:$4 sm:$0xff]   ;;  %v5296_v59 = vld [vmem:[#allocation5 + $0x76c] ss:$16 sps:$4 sm:$0xff]  }
 0x120   :  { %3310 = vmatpush1.bf16.msra.mxu0 %v5201_v60  ;;  %3638 = vmatpush1.bf16.msra.mxu1 %v5204_v61  ;;  %v5291_v60 = vld [vmem:[#allocation5 + $0x760] ss:$16 sps:$4 sm:$0xff]   ;;  %v5294_v61 = vld [vmem:[#allocation5 + $0x768] ss:$16 sps:$4 sm:$0xff]  }
 0x121   :  { %3311 = vmatprep.subr.bf16.mxu0 %v5209_v62  ;;  %3639 = vmatprep.subr.bf16.mxu1 %v5212_v63  ;;  %v5299_v62 = vld [vmem:[#allocation5 + $0x784] ss:$16 sps:$4 sm:$0xff]   ;;  %v5302_v63 = vld [vmem:[#allocation5 + $0x78c] ss:$16 sps:$4 sm:$0xff]  }
 0x124   :  { %3312 = vmatpush1.bf16.msra.mxu0 %v5207_v0  ;;  %3640 = vmatpush1.bf16.msra.mxu1 %v5210_v1  ;;  %v5297_v0 = vld [vmem:[#allocation5 + $0x780] ss:$16 sps:$4 sm:$0xff]   ;;  %v5300_v1 = vld [vmem:[#allocation5 + $0x788] ss:$16 sps:$4 sm:$0xff]  }
 0x125   :  { %3313 = vmatprep.subr.bf16.mxu0 %v5215_v2  ;;  %3641 = vmatprep.subr.bf16.mxu1 %v5218_v3  ;;  %v5305_v2 = vld [vmem:[#allocation5 + $0x7a4] ss:$16 sps:$4 sm:$0xff]   ;;  %v5308_v3 = vld [vmem:[#allocation5 + $0x7ac] ss:$16 sps:$4 sm:$0xff]  }
 0x128   :  { %3314 = vmatpush1.bf16.msra.mxu0 %v5213_v4  ;;  %3642 = vmatpush1.bf16.msra.mxu1 %v5216_v5  ;;  %v5303_v4 = vld [vmem:[#allocation5 + $0x7a0] ss:$16 sps:$4 sm:$0xff]   ;;  %v5306_v5 = vld [vmem:[#allocation5 + $0x7a8] ss:$16 sps:$4 sm:$0xff]  }
 0x129   :  { %3315 = vmatprep.subr.bf16.mxu0 %v5221_v6  ;;  %3643 = vmatprep.subr.bf16.mxu1 %v5224_v7  ;;  %v5311_v6 = vld [vmem:[#allocation5 + $0x7c4] ss:$16 sps:$4 sm:$0xff]   ;;  %v5314_v7 = vld [vmem:[#allocation5 + $0x7cc] ss:$16 sps:$4 sm:$0xff]  }
 0x12c   :  { %3316 = vmatpush1.bf16.msra.mxu0 %v5219_v8  ;;  %3644 = vmatpush1.bf16.msra.mxu1 %v5222_v9  ;;  %v5309_v8 = vld [vmem:[#allocation5 + $0x7c0] ss:$16 sps:$4 sm:$0xff]   ;;  %v5312_v9 = vld [vmem:[#allocation5 + $0x7c8] ss:$16 sps:$4 sm:$0xff]  }
 0x12d   :  { %3326 = vmatprep.subr.bf16.mxu0 %v5227_v10  ;;  %3654 = vmatprep.subr.bf16.mxu1 %v5230_v12  ;;  %v5317_v10 = vld [vmem:[#allocation5 + $0x7e4] ss:$16 sps:$4 sm:$0xff]   ;;  %v5315_v12 = vld [vmem:[#allocation5 + $0x7e0] ss:$16 sps:$4 sm:$0xff]  }
 0x12f   :  { %3318 = vmatmul.mubr.bf16.vlgmr.msra.gmra.mrb[0].mxu0 %v119_v15  ;;  %3646 = vmatmul.mubr.bf16.vlgmr.msra.gmra.mrb[0].mxu1 %v119_v15  ;;  %v5323_v15 = vld [vmem:[#allocation5 + $0x804] ss:$16 sps:$4 sm:$0xff]  }
 0x130   :  { %3327 = vmatpush1.bf16.msra.mxu0 %v5225_v13  ;;  %3655 = vmatpush1.bf16.msra.mxu1 %v5228_v14  ;;  %v5318_v13 = vld [vmem:[#allocation5 + $0x7e8] ss:$16 sps:$4 sm:$0xff]   ;;  %v105_v14 = vld [vmem:[#allocation2 + $0x30] sm:$0xff] }
 0x131   :  { %3328 = vmatprep.subr.bf16.mxu0 %v5233_v17  ;;  %3656 = vmatprep.subr.bf16.mxu1 %v5236_v18  ;;  %v121_v17 = vpack.c.bf16 %v105_v14, %v105_v14  ;;  %v108_v18 = vld [vmem:[#allocation2 + $0x48] sm:$0xff]  ;;  %v5413_v14 = vld [vmem:[#allocation5 + $0x9e4] ss:$16 sps:$4 sm:$0xff]  }
 0x132   :  { %3358 = vmatprep.mubr.bf16.mxu0 %v122_v19  ;;  %3686 = vmatprep.mubr.bf16.mxu1 %v122_v19  ;;  %v5321_v19 = vld [vmem:[#allocation5 + $0x800] ss:$16 sps:$4 sm:$0xff]  }
 0x134   :  { %3329 = vmatpush1.bf16.msra.mxu0 %v5231_v20  ;;  %3657 = vmatpush1.bf16.msra.mxu1 %v5234_v21  ;;  %v5324_v20 = vld [vmem:[#allocation5 + $0x808] ss:$16 sps:$4 sm:$0xff]   ;;  %v5329_v21 = vld [vmem:[#allocation5 + $0x824] ss:$16 sps:$4 sm:$0xff]  }
 0x135   :  { %3330 = vmatprep.subr.bf16.mxu0 %v5239_v22  ;;  %3658 = vmatprep.subr.bf16.mxu1 %v5242_v23  ;;  %v5332_v22 = vld [vmem:[#allocation5 + $0x82c] ss:$16 sps:$4 sm:$0xff]   ;;  %v124_v23 = vpack.c.bf16 %v108_v18, %v108_v18  ;;  %v5419_v18 = vld [vmem:[#allocation5 + $0xa04] ss:$16 sps:$4 sm:$0xff]  }
 0x138   :  { %3331 = vmatpush1.bf16.msra.mxu0 %v5237_v24  ;;  %3659 = vmatpush1.bf16.msra.mxu1 %v5240_v25  ;;  %v5327_v24 = vld [vmem:[#allocation5 + $0x820] ss:$16 sps:$4 sm:$0xff]   ;;  %v5330_v25 = vld [vmem:[#allocation5 + $0x828] ss:$16 sps:$4 sm:$0xff]  }
 0x139   :  { %3332 = vmatprep.subr.bf16.mxu0 %v5245_v26  ;;  %3660 = vmatprep.subr.bf16.mxu1 %v5248_v27  ;;  %v5335_v26 = vld [vmem:[#allocation5 + $0x844] ss:$16 sps:$4 sm:$0xff]   ;;  %v5338_v27 = vld [vmem:[#allocation5 + $0x84c] ss:$16 sps:$4 sm:$0xff]  }
 0x13c   :  { %3333 = vmatpush1.bf16.msra.mxu0 %v5243_v28  ;;  %3661 = vmatpush1.bf16.msra.mxu1 %v5246_v29  ;;  %v5333_v28 = vld [vmem:[#allocation5 + $0x840] ss:$16 sps:$4 sm:$0xff]   ;;  %v5336_v29 = vld [vmem:[#allocation5 + $0x848] ss:$16 sps:$4 sm:$0xff]  }
 0x13d   :  { %3334 = vmatprep.subr.bf16.mxu0 %v5251_v30  ;;  %3662 = vmatprep.subr.bf16.mxu1 %v5254_v31  ;;  %v5341_v30 = vld [vmem:[#allocation5 + $0x864] ss:$16 sps:$4 sm:$0xff]   ;;  %v5344_v31 = vld [vmem:[#allocation5 + $0x86c] ss:$16 sps:$4 sm:$0xff]  }
 0x140   :  { %3335 = vmatpush1.bf16.msra.mxu0 %v5249_v32  ;;  %3663 = vmatpush1.bf16.msra.mxu1 %v5252_v33  ;;  %v5339_v32 = vld [vmem:[#allocation5 + $0x860] ss:$16 sps:$4 sm:$0xff]   ;;  %v5342_v33 = vld [vmem:[#allocation5 + $0x868] ss:$16 sps:$4 sm:$0xff]  }
 0x141   :  { %3336 = vmatprep.subr.bf16.mxu0 %v5257_v34  ;;  %3664 = vmatprep.subr.bf16.mxu1 %v5260_v35  ;;  %v5347_v34 = vld [vmem:[#allocation5 + $0x884] ss:$16 sps:$4 sm:$0xff]   ;;  %v5350_v35 = vld [vmem:[#allocation5 + $0x88c] ss:$16 sps:$4 sm:$0xff]  }
 0x144   :  { %3337 = vmatpush1.bf16.msra.mxu0 %v5255_v36  ;;  %3665 = vmatpush1.bf16.msra.mxu1 %v5258_v37  ;;  %v5345_v36 = vld [vmem:[#allocation5 + $0x880] ss:$16 sps:$4 sm:$0xff]   ;;  %v5348_v37 = vld [vmem:[#allocation5 + $0x888] ss:$16 sps:$4 sm:$0xff]  }
 0x145   :  { %3338 = vmatprep.subr.bf16.mxu0 %v5263_v38  ;;  %3666 = vmatprep.subr.bf16.mxu1 %v5266_v39  ;;  %v5353_v38 = vld [vmem:[#allocation5 + $0x8a4] ss:$16 sps:$4 sm:$0xff]   ;;  %v5356_v39 = vld [vmem:[#allocation5 + $0x8ac] ss:$16 sps:$4 sm:$0xff]  }
 0x148   :  { %3339 = vmatpush1.bf16.msra.mxu0 %v5261_v40  ;;  %3667 = vmatpush1.bf16.msra.mxu1 %v5264_v41  ;;  %v5351_v40 = vld [vmem:[#allocation5 + $0x8a0] ss:$16 sps:$4 sm:$0xff]   ;;  %v5354_v41 = vld [vmem:[#allocation5 + $0x8a8] ss:$16 sps:$4 sm:$0xff]  }
 0x149   :  { %3340 = vmatprep.subr.bf16.mxu0 %v5269_v42  ;;  %3668 = vmatprep.subr.bf16.mxu1 %v5272_v43  ;;  %v5359_v42 = vld [vmem:[#allocation5 + $0x8c4] ss:$16 sps:$4 sm:$0xff]   ;;  %v5362_v43 = vld [vmem:[#allocation5 + $0x8cc] ss:$16 sps:$4 sm:$0xff]  }
 0x14c   :  { %3341 = vmatpush1.bf16.msra.mxu0 %v5267_v44  ;;  %3669 = vmatpush1.bf16.msra.mxu1 %v5270_v45  ;;  %v5357_v44 = vld [vmem:[#allocation5 + $0x8c0] ss:$16 sps:$4 sm:$0xff]   ;;  %v5360_v45 = vld [vmem:[#allocation5 + $0x8c8] ss:$16 sps:$4 sm:$0xff]  }
 0x14d   :  { %3342 = vmatprep.subr.bf16.mxu0 %v5275_v46  ;;  %3670 = vmatprep.subr.bf16.mxu1 %v5278_v47  ;;  %v5365_v46 = vld [vmem:[#allocation5 + $0x8e4] ss:$16 sps:$4 sm:$0xff]   ;;  %v5368_v47 = vld [vmem:[#allocation5 + $0x8ec] ss:$16 sps:$4 sm:$0xff]  }
 0x150   :  { %3343 = vmatpush1.bf16.msra.mxu0 %v5273_v48  ;;  %3671 = vmatpush1.bf16.msra.mxu1 %v5276_v49  ;;  %v5363_v48 = vld [vmem:[#allocation5 + $0x8e0] ss:$16 sps:$4 sm:$0xff]   ;;  %v5366_v49 = vld [vmem:[#allocation5 + $0x8e8] ss:$16 sps:$4 sm:$0xff]  }
 0x151   :  { %3344 = vmatprep.subr.bf16.mxu0 %v5281_v50  ;;  %3672 = vmatprep.subr.bf16.mxu1 %v5284_v51  ;;  %v5371_v50 = vld [vmem:[#allocation5 + $0x904] ss:$16 sps:$4 sm:$0xff]   ;;  %v5374_v51 = vld [vmem:[#allocation5 + $0x90c] ss:$16 sps:$4 sm:$0xff]  }
 0x154   :  { %3345 = vmatpush1.bf16.msra.mxu0 %v5279_v52  ;;  %3673 = vmatpush1.bf16.msra.mxu1 %v5282_v53  ;;  %v5369_v52 = vld [vmem:[#allocation5 + $0x900] ss:$16 sps:$4 sm:$0xff]   ;;  %v5372_v53 = vld [vmem:[#allocation5 + $0x908] ss:$16 sps:$4 sm:$0xff]  }
 0x155   :  { %3346 = vmatprep.subr.bf16.mxu0 %v5287_v54  ;;  %3674 = vmatprep.subr.bf16.mxu1 %v5290_v55  ;;  %v5377_v54 = vld [vmem:[#allocation5 + $0x924] ss:$16 sps:$4 sm:$0xff]   ;;  %v5380_v55 = vld [vmem:[#allocation5 + $0x92c] ss:$16 sps:$4 sm:$0xff]  }
 0x158   :  { %3347 = vmatpush1.bf16.msra.mxu0 %v5285_v56  ;;  %3675 = vmatpush1.bf16.msra.mxu1 %v5288_v57  ;;  %v5375_v56 = vld [vmem:[#allocation5 + $0x920] ss:$16 sps:$4 sm:$0xff]   ;;  %v5378_v57 = vld [vmem:[#allocation5 + $0x928] ss:$16 sps:$4 sm:$0xff]  }
 0x159   :  { %3348 = vmatprep.subr.bf16.mxu0 %v5293_v58  ;;  %3676 = vmatprep.subr.bf16.mxu1 %v5296_v59  ;;  %v5383_v58 = vld [vmem:[#allocation5 + $0x944] ss:$16 sps:$4 sm:$0xff]   ;;  %v5386_v59 = vld [vmem:[#allocation5 + $0x94c] ss:$16 sps:$4 sm:$0xff]  }
 0x15c   :  { %3349 = vmatpush1.bf16.msra.mxu0 %v5291_v60  ;;  %3677 = vmatpush1.bf16.msra.mxu1 %v5294_v61  ;;  %v5381_v60 = vld [vmem:[#allocation5 + $0x940] ss:$16 sps:$4 sm:$0xff]   ;;  %v5384_v61 = vld [vmem:[#allocation5 + $0x948] ss:$16 sps:$4 sm:$0xff]  }
 0x15d   :  { %3350 = vmatprep.subr.bf16.mxu0 %v5299_v62  ;;  %3678 = vmatprep.subr.bf16.mxu1 %v5302_v63  ;;  %v5389_v62 = vld [vmem:[#allocation5 + $0x964] ss:$16 sps:$4 sm:$0xff]   ;;  %v5392_v63 = vld [vmem:[#allocation5 + $0x96c] ss:$16 sps:$4 sm:$0xff]  }
 0x160   :  { %3351 = vmatpush1.bf16.msra.mxu0 %v5297_v0  ;;  %3679 = vmatpush1.bf16.msra.mxu1 %v5300_v1  ;;  %v5387_v0 = vld [vmem:[#allocation5 + $0x960] ss:$16 sps:$4 sm:$0xff]   ;;  %v5390_v1 = vld [vmem:[#allocation5 + $0x968] ss:$16 sps:$4 sm:$0xff]  }
 0x161   :  { %3352 = vmatprep.subr.bf16.mxu0 %v5305_v2  ;;  %3680 = vmatprep.subr.bf16.mxu1 %v5308_v3  ;;  %v5395_v2 = vld [vmem:[#allocation5 + $0x984] ss:$16 sps:$4 sm:$0xff]   ;;  %v5398_v3 = vld [vmem:[#allocation5 + $0x98c] ss:$16 sps:$4 sm:$0xff]  }
 0x164   :  { %3353 = vmatpush1.bf16.msra.mxu0 %v5303_v4  ;;  %3681 = vmatpush1.bf16.msra.mxu1 %v5306_v5  ;;  %v5393_v4 = vld [vmem:[#allocation5 + $0x980] ss:$16 sps:$4 sm:$0xff]   ;;  %v5396_v5 = vld [vmem:[#allocation5 + $0x988] ss:$16 sps:$4 sm:$0xff]  }
 0x165   :  { %3354 = vmatprep.subr.bf16.mxu0 %v5311_v6  ;;  %3682 = vmatprep.subr.bf16.mxu1 %v5314_v7  ;;  %v5401_v6 = vld [vmem:[#allocation5 + $0x9a4] ss:$16 sps:$4 sm:$0xff]   ;;  %v5404_v7 = vld [vmem:[#allocation5 + $0x9ac] ss:$16 sps:$4 sm:$0xff]  }
 0x168   :  { %3355 = vmatpush1.bf16.msra.mxu0 %v5309_v8  ;;  %3683 = vmatpush1.bf16.msra.mxu1 %v5312_v9  ;;  %v5399_v8 = vld [vmem:[#allocation5 + $0x9a0] ss:$16 sps:$4 sm:$0xff]   ;;  %v5402_v9 = vld [vmem:[#allocation5 + $0x9a8] ss:$16 sps:$4 sm:$0xff]  }
 0x169   :  { %3356 = vmatprep.subr.bf16.mxu0 %v5317_v10  ;;  %3684 = vmatprep.subr.bf16.mxu1 %v5320_v11  ;;  %v5407_v10 = vld [vmem:[#allocation5 + $0x9c4] ss:$16 sps:$4 sm:$0xff]   ;;  %v5410_v11 = vld [vmem:[#allocation5 + $0x9cc] ss:$16 sps:$4 sm:$0xff]  }
 0x16c   :  { %3357 = vmatpush1.bf16.msra.mxu0 %v5315_v12  ;;  %3685 = vmatpush1.bf16.msra.mxu1 %v5318_v13  ;;  %v5405_v12 = vld [vmem:[#allocation5 + $0x9c0] ss:$16 sps:$4 sm:$0xff]   ;;  %v5408_v13 = vld [vmem:[#allocation5 + $0x9c8] ss:$16 sps:$4 sm:$0xff]  }
 0x16d   :  { %3367 = vmatprep.subr.bf16.mxu0 %v5323_v15  ;;  %3695 = vmatprep.subr.bf16.mxu1 %v5326_v16  ;;  %v5416_v15 = vld [vmem:[#allocation5 + $0x9ec] ss:$16 sps:$4 sm:$0xff]   ;;  %v5411_v16 = vld [vmem:[#allocation5 + $0x9e0] ss:$16 sps:$4 sm:$0xff]  }
 0x16f   :  { %3359 = vmatmul.mubr.bf16.vlgmr.msra.gmra.mrb[0].mxu0 %v121_v17  ;;  %3687 = vmatmul.mubr.bf16.vlgmr.msra.gmra.mrb[0].mxu1 %v121_v17  ;;  %v5414_v17 = vld [vmem:[#allocation5 + $0x9e8] ss:$16 sps:$4 sm:$0xff]  }
 0x170   :  { %3368 = vmatpush1.bf16.msra.mxu0 %v5321_v19  ;;  %3696 = vmatpush1.bf16.msra.mxu1 %v5324_v20  ;;  %v107_v19 = vld [vmem:[#allocation2 + $0x40] sm:$0xff]  ;;  %v5422_v20 = vld [vmem:[#allocation5 + $0xa0c] ss:$16 sps:$4 sm:$0xff]  }
 0x171   :  { %3369 = vmatprep.subr.bf16.mxu0 %v5329_v21  ;;  %3697 = vmatprep.subr.bf16.mxu1 %v5332_v22  ;;  %v110_v21 = vld [vmem:[#allocation2 + $0x58] sm:$0xff]  ;;  %v123_v22 = vpack.c.bf16 %v107_v19, %v107_v19 }
 0x172   :  { %3399 = vmatprep.mubr.bf16.mxu0 %v124_v23  ;;  %3727 = vmatprep.mubr.bf16.mxu1 %v124_v23  ;;  %v5417_v23 = vld [vmem:[#allocation5 + $0xa00] ss:$16 sps:$4 sm:$0xff]   ;;  %v5512_v19 = vld [vmem:[#allocation5 + $0xbec] ss:$16 sps:$4 sm:$0xff]  }
 0x174   :  { %3370 = vmatpush1.bf16.msra.mxu0 %v5327_v24  ;;  %3698 = vmatpush1.bf16.msra.mxu1 %v5330_v25  ;;  %v5420_v24 = vld [vmem:[#allocation5 + $0xa08] ss:$16 sps:$4 sm:$0xff]   ;;  %v5425_v25 = vld [vmem:[#allocation5 + $0xa24] ss:$16 sps:$4 sm:$0xff]  }
 0x175   :  { %3371 = vmatprep.subr.bf16.mxu0 %v5335_v26  ;;  %3699 = vmatprep.subr.bf16.mxu1 %v5338_v27  ;;  %v5428_v26 = vld [vmem:[#allocation5 + $0xa2c] ss:$16 sps:$4 sm:$0xff]   ;;  %v126_v27 = vpack.c.bf16 %v110_v21, %v110_v21  ;;  %v5510_v21 = vld [vmem:[#allocation5 + $0xbe8] ss:$16 sps:$4 sm:$0xff]  }
 0x178   :  { %3372 = vmatpush1.bf16.msra.mxu0 %v5333_v28  ;;  %3700 = vmatpush1.bf16.msra.mxu1 %v5336_v29  ;;  %v5423_v28 = vld [vmem:[#allocation5 + $0xa20] ss:$16 sps:$4 sm:$0xff]   ;;  %v5426_v29 = vld [vmem:[#allocation5 + $0xa28] ss:$16 sps:$4 sm:$0xff]  }
 0x179   :  { %3373 = vmatprep.subr.bf16.mxu0 %v5341_v30  ;;  %3701 = vmatprep.subr.bf16.mxu1 %v5344_v31  ;;  %v5431_v30 = vld [vmem:[#allocation5 + $0xa44] ss:$16 sps:$4 sm:$0xff]   ;;  %v5434_v31 = vld [vmem:[#allocation5 + $0xa4c] ss:$16 sps:$4 sm:$0xff]  }
 0x17c   :  { %3374 = vmatpush1.bf16.msra.mxu0 %v5339_v32  ;;  %3702 = vmatpush1.bf16.msra.mxu1 %v5342_v33  ;;  %v5429_v32 = vld [vmem:[#allocation5 + $0xa40] ss:$16 sps:$4 sm:$0xff]   ;;  %v5432_v33 = vld [vmem:[#allocation5 + $0xa48] ss:$16 sps:$4 sm:$0xff]  }
 0x17d   :  { %3375 = vmatprep.subr.bf16.mxu0 %v5347_v34  ;;  %3703 = vmatprep.subr.bf16.mxu1 %v5350_v35  ;;  %v5437_v34 = vld [vmem:[#allocation5 + $0xa64] ss:$16 sps:$4 sm:$0xff]   ;;  %v5440_v35 = vld [vmem:[#allocation5 + $0xa6c] ss:$16 sps:$4 sm:$0xff]  }
 0x180   :  { %3376 = vmatpush1.bf16.msra.mxu0 %v5345_v36  ;;  %3704 = vmatpush1.bf16.msra.mxu1 %v5348_v37  ;;  %v5435_v36 = vld [vmem:[#allocation5 + $0xa60] ss:$16 sps:$4 sm:$0xff]   ;;  %v5438_v37 = vld [vmem:[#allocation5 + $0xa68] ss:$16 sps:$4 sm:$0xff]  }
 0x181   :  { %3377 = vmatprep.subr.bf16.mxu0 %v5353_v38  ;;  %3705 = vmatprep.subr.bf16.mxu1 %v5356_v39  ;;  %v5443_v38 = vld [vmem:[#allocation5 + $0xa84] ss:$16 sps:$4 sm:$0xff]   ;;  %v5446_v39 = vld [vmem:[#allocation5 + $0xa8c] ss:$16 sps:$4 sm:$0xff]  }
 0x184   :  { %3378 = vmatpush1.bf16.msra.mxu0 %v5351_v40  ;;  %3706 = vmatpush1.bf16.msra.mxu1 %v5354_v41  ;;  %v5441_v40 = vld [vmem:[#allocation5 + $0xa80] ss:$16 sps:$4 sm:$0xff]   ;;  %v5444_v41 = vld [vmem:[#allocation5 + $0xa88] ss:$16 sps:$4 sm:$0xff]  }
 0x185   :  { %3379 = vmatprep.subr.bf16.mxu0 %v5359_v42  ;;  %3707 = vmatprep.subr.bf16.mxu1 %v5362_v43  ;;  %v5449_v42 = vld [vmem:[#allocation5 + $0xaa4] ss:$16 sps:$4 sm:$0xff]   ;;  %v5452_v43 = vld [vmem:[#allocation5 + $0xaac] ss:$16 sps:$4 sm:$0xff]  }
 0x188   :  { %3380 = vmatpush1.bf16.msra.mxu0 %v5357_v44  ;;  %3708 = vmatpush1.bf16.msra.mxu1 %v5360_v45  ;;  %v5447_v44 = vld [vmem:[#allocation5 + $0xaa0] ss:$16 sps:$4 sm:$0xff]   ;;  %v5450_v45 = vld [vmem:[#allocation5 + $0xaa8] ss:$16 sps:$4 sm:$0xff]  }
 0x189   :  { %3381 = vmatprep.subr.bf16.mxu0 %v5365_v46  ;;  %3709 = vmatprep.subr.bf16.mxu1 %v5368_v47  ;;  %v5455_v46 = vld [vmem:[#allocation5 + $0xac4] ss:$16 sps:$4 sm:$0xff]   ;;  %v5458_v47 = vld [vmem:[#allocation5 + $0xacc] ss:$16 sps:$4 sm:$0xff]  }
 0x18c   :  { %3382 = vmatpush1.bf16.msra.mxu0 %v5363_v48  ;;  %3710 = vmatpush1.bf16.msra.mxu1 %v5366_v49  ;;  %v5453_v48 = vld [vmem:[#allocation5 + $0xac0] ss:$16 sps:$4 sm:$0xff]   ;;  %v5456_v49 = vld [vmem:[#allocation5 + $0xac8] ss:$16 sps:$4 sm:$0xff]  }
 0x18d   :  { %3383 = vmatprep.subr.bf16.mxu0 %v5371_v50  ;;  %3711 = vmatprep.subr.bf16.mxu1 %v5374_v51  ;;  %v5461_v50 = vld [vmem:[#allocation5 + $0xae4] ss:$16 sps:$4 sm:$0xff]   ;;  %v5464_v51 = vld [vmem:[#allocation5 + $0xaec] ss:$16 sps:$4 sm:$0xff]  }
 0x190   :  { %3384 = vmatpush1.bf16.msra.mxu0 %v5369_v52  ;;  %3712 = vmatpush1.bf16.msra.mxu1 %v5372_v53  ;;  %v5459_v52 = vld [vmem:[#allocation5 + $0xae0] ss:$16 sps:$4 sm:$0xff]   ;;  %v5462_v53 = vld [vmem:[#allocation5 + $0xae8] ss:$16 sps:$4 sm:$0xff]  }
 0x191   :  { %3385 = vmatprep.subr.bf16.mxu0 %v5377_v54  ;;  %3713 = vmatprep.subr.bf16.mxu1 %v5380_v55  ;;  %v5467_v54 = vld [vmem:[#allocation5 + $0xb04] ss:$16 sps:$4 sm:$0xff]   ;;  %v5470_v55 = vld [vmem:[#allocation5 + $0xb0c] ss:$16 sps:$4 sm:$0xff]  }
 0x194   :  { %3386 = vmatpush1.bf16.msra.mxu0 %v5375_v56  ;;  %3714 = vmatpush1.bf16.msra.mxu1 %v5378_v57  ;;  %v5465_v56 = vld [vmem:[#allocation5 + $0xb00] ss:$16 sps:$4 sm:$0xff]   ;;  %v5468_v57 = vld [vmem:[#allocation5 + $0xb08] ss:$16 sps:$4 sm:$0xff]  }
 0x195   :  { %3387 = vmatprep.subr.bf16.mxu0 %v5383_v58  ;;  %3715 = vmatprep.subr.bf16.mxu1 %v5386_v59  ;;  %v5473_v58 = vld [vmem:[#allocation5 + $0xb24] ss:$16 sps:$4 sm:$0xff]   ;;  %v5476_v59 = vld [vmem:[#allocation5 + $0xb2c] ss:$16 sps:$4 sm:$0xff]  }
 0x198   :  { %3388 = vmatpush1.bf16.msra.mxu0 %v5381_v60  ;;  %3716 = vmatpush1.bf16.msra.mxu1 %v5384_v61  ;;  %v5471_v60 = vld [vmem:[#allocation5 + $0xb20] ss:$16 sps:$4 sm:$0xff]   ;;  %v5474_v61 = vld [vmem:[#allocation5 + $0xb28] ss:$16 sps:$4 sm:$0xff]  }
 0x199   :  { %3389 = vmatprep.subr.bf16.mxu0 %v5389_v62  ;;  %3717 = vmatprep.subr.bf16.mxu1 %v5392_v63  ;;  %v5479_v62 = vld [vmem:[#allocation5 + $0xb44] ss:$16 sps:$4 sm:$0xff]   ;;  %v5482_v63 = vld [vmem:[#allocation5 + $0xb4c] ss:$16 sps:$4 sm:$0xff]  }
 0x19c   :  { %3390 = vmatpush1.bf16.msra.mxu0 %v5387_v0  ;;  %3718 = vmatpush1.bf16.msra.mxu1 %v5390_v1  ;;  %v5477_v0 = vld [vmem:[#allocation5 + $0xb40] ss:$16 sps:$4 sm:$0xff]   ;;  %v5480_v1 = vld [vmem:[#allocation5 + $0xb48] ss:$16 sps:$4 sm:$0xff]  }
 0x19d   :  { %3391 = vmatprep.subr.bf16.mxu0 %v5395_v2  ;;  %3719 = vmatprep.subr.bf16.mxu1 %v5398_v3  ;;  %v5485_v2 = vld [vmem:[#allocation5 + $0xb64] ss:$16 sps:$4 sm:$0xff]   ;;  %v5488_v3 = vld [vmem:[#allocation5 + $0xb6c] ss:$16 sps:$4 sm:$0xff]  }
 0x1a0   :  { %3392 = vmatpush1.bf16.msra.mxu0 %v5393_v4  ;;  %3720 = vmatpush1.bf16.msra.mxu1 %v5396_v5  ;;  %v5483_v4 = vld [vmem:[#allocation5 + $0xb60] ss:$16 sps:$4 sm:$0xff]   ;;  %v5486_v5 = vld [vmem:[#allocation5 + $0xb68] ss:$16 sps:$4 sm:$0xff]  }
 0x1a1   :  { %3393 = vmatprep.subr.bf16.mxu0 %v5401_v6  ;;  %3721 = vmatprep.subr.bf16.mxu1 %v5404_v7  ;;  %v5491_v6 = vld [vmem:[#allocation5 + $0xb84] ss:$16 sps:$4 sm:$0xff]   ;;  %v5494_v7 = vld [vmem:[#allocation5 + $0xb8c] ss:$16 sps:$4 sm:$0xff]  }
 0x1a4   :  { %3394 = vmatpush1.bf16.msra.mxu0 %v5399_v8  ;;  %3722 = vmatpush1.bf16.msra.mxu1 %v5402_v9  ;;  %v5489_v8 = vld [vmem:[#allocation5 + $0xb80] ss:$16 sps:$4 sm:$0xff]   ;;  %v5492_v9 = vld [vmem:[#allocation5 + $0xb88] ss:$16 sps:$4 sm:$0xff]  }
 0x1a5   :  { %3395 = vmatprep.subr.bf16.mxu0 %v5407_v10  ;;  %3723 = vmatprep.subr.bf16.mxu1 %v5410_v11  ;;  %v5497_v10 = vld [vmem:[#allocation5 + $0xba4] ss:$16 sps:$4 sm:$0xff]   ;;  %v5500_v11 = vld [vmem:[#allocation5 + $0xbac] ss:$16 sps:$4 sm:$0xff]  }
 0x1a8   :  { %3396 = vmatpush1.bf16.msra.mxu0 %v5405_v12  ;;  %3724 = vmatpush1.bf16.msra.mxu1 %v5408_v13  ;;  %v5495_v12 = vld [vmem:[#allocation5 + $0xba0] ss:$16 sps:$4 sm:$0xff]   ;;  %v5498_v13 = vld [vmem:[#allocation5 + $0xba8] ss:$16 sps:$4 sm:$0xff]  }
 0x1a9   :  { %3397 = vmatprep.subr.bf16.mxu0 %v5413_v14  ;;  %3725 = vmatprep.subr.bf16.mxu1 %v5416_v15  ;;  %v5503_v14 = vld [vmem:[#allocation5 + $0xbc4] ss:$16 sps:$4 sm:$0xff]   ;;  %v5506_v15 = vld [vmem:[#allocation5 + $0xbcc] ss:$16 sps:$4 sm:$0xff]  }
 0x1ac   :  { %3398 = vmatpush1.bf16.msra.mxu0 %v5411_v16  ;;  %3726 = vmatpush1.bf16.msra.mxu1 %v5414_v17  ;;  %v5501_v16 = vld [vmem:[#allocation5 + $0xbc0] ss:$16 sps:$4 sm:$0xff]   ;;  %v5504_v17 = vld [vmem:[#allocation5 + $0xbc8] ss:$16 sps:$4 sm:$0xff]  }
 0x1ad   :  { %3408 = vmatprep.subr.bf16.mxu0 %v5419_v18  ;;  %3736 = vmatprep.subr.bf16.mxu1 %v5422_v20  ;;  %v5509_v18 = vld [vmem:[#allocation5 + $0xbe4] ss:$16 sps:$4 sm:$0xff]   ;;  %v5507_v20 = vld [vmem:[#allocation5 + $0xbe0] ss:$16 sps:$4 sm:$0xff]  }
 0x1af   :  { %3400 = vmatmul.mubr.bf16.vlgmr.msra.gmra.mrb[0].mxu0 %v123_v22  ;;  %3728 = vmatmul.mubr.bf16.vlgmr.msra.gmra.mrb[0].mxu1 %v123_v22  ;;  %v109_v22 = vld [vmem:[#allocation2 + $0x50] sm:$0xff] }
 0x1b0   :  { %3409 = vmatpush1.bf16.msra.mxu0 %v5417_v23  ;;  %3737 = vmatpush1.bf16.msra.mxu1 %v5420_v24  ;;  %v5515_v23 = vld [vmem:[#allocation5 + $0xc04] ss:$16 sps:$4 sm:$0xff]   ;;  %v5518_v24 = vld [vmem:[#allocation5 + $0xc0c] ss:$16 sps:$4 sm:$0xff]  }
 0x1b1   :  { %3410 = vmatprep.subr.bf16.mxu0 %v5425_v25  ;;  %3738 = vmatprep.subr.bf16.mxu1 %v5428_v26  ;;  %v125_v25 = vpack.c.bf16 %v109_v22, %v109_v22  ;;  %v112_v26 = vld [vmem:[#allocation2 + $0x68] sm:$0xff]  ;;  %v5605_v22 = vld [vmem:[#allocation5 + $0xde4] ss:$16 sps:$4 sm:$0xff]  }
 0x1b2   :  { %3440 = vmatprep.mubr.bf16.mxu0 %v126_v27  ;;  %3768 = vmatprep.mubr.bf16.mxu1 %v126_v27  ;;  %v5513_v27 = vld [vmem:[#allocation5 + $0xc00] ss:$16 sps:$4 sm:$0xff]  }
 0x1b4   :  { %3411 = vmatpush1.bf16.msra.mxu0 %v5423_v28  ;;  %3739 = vmatpush1.bf16.msra.mxu1 %v5426_v29  ;;  %v5516_v28 = vld [vmem:[#allocation5 + $0xc08] ss:$16 sps:$4 sm:$0xff]   ;;  %v5521_v29 = vld [vmem:[#allocation5 + $0xc24] ss:$16 sps:$4 sm:$0xff]  }
 0x1b5   :  { %3412 = vmatprep.subr.bf16.mxu0 %v5431_v30  ;;  %3740 = vmatprep.subr.bf16.mxu1 %v5434_v31  ;;  %v5524_v30 = vld [vmem:[#allocation5 + $0xc2c] ss:$16 sps:$4 sm:$0xff]   ;;  %v128_v31 = vpack.c.bf16 %v112_v26, %v112_v26  ;;  %v111_v26 = vld [vmem:[#allocation2 + $0x60] sm:$0xff] }
 0x1b8   :  { %3413 = vmatpush1.bf16.msra.mxu0 %v5429_v32  ;;  %3741 = vmatpush1.bf16.msra.mxu1 %v5432_v33  ;;  %v5519_v32 = vld [vmem:[#allocation5 + $0xc20] ss:$16 sps:$4 sm:$0xff]   ;;  %v5522_v33 = vld [vmem:[#allocation5 + $0xc28] ss:$16 sps:$4 sm:$0xff]  }
 0x1b9   :  { %3414 = vmatprep.subr.bf16.mxu0 %v5437_v34  ;;  %3742 = vmatprep.subr.bf16.mxu1 %v5440_v35  ;;  %v5527_v34 = vld [vmem:[#allocation5 + $0xc44] ss:$16 sps:$4 sm:$0xff]   ;;  %v5530_v35 = vld [vmem:[#allocation5 + $0xc4c] ss:$16 sps:$4 sm:$0xff]  }
 0x1bc   :  { %3415 = vmatpush1.bf16.msra.mxu0 %v5435_v36  ;;  %3743 = vmatpush1.bf16.msra.mxu1 %v5438_v37  ;;  %v5525_v36 = vld [vmem:[#allocation5 + $0xc40] ss:$16 sps:$4 sm:$0xff]   ;;  %v5528_v37 = vld [vmem:[#allocation5 + $0xc48] ss:$16 sps:$4 sm:$0xff]  }
 0x1bd   :  { %3416 = vmatprep.subr.bf16.mxu0 %v5443_v38  ;;  %3744 = vmatprep.subr.bf16.mxu1 %v5446_v39  ;;  %v5533_v38 = vld [vmem:[#allocation5 + $0xc64] ss:$16 sps:$4 sm:$0xff]   ;;  %v5536_v39 = vld [vmem:[#allocation5 + $0xc6c] ss:$16 sps:$4 sm:$0xff]  }
 0x1c0   :  { %3417 = vmatpush1.bf16.msra.mxu0 %v5441_v40  ;;  %3745 = vmatpush1.bf16.msra.mxu1 %v5444_v41  ;;  %v5531_v40 = vld [vmem:[#allocation5 + $0xc60] ss:$16 sps:$4 sm:$0xff]   ;;  %v5534_v41 = vld [vmem:[#allocation5 + $0xc68] ss:$16 sps:$4 sm:$0xff]  }
 0x1c1   :  { %3418 = vmatprep.subr.bf16.mxu0 %v5449_v42  ;;  %3746 = vmatprep.subr.bf16.mxu1 %v5452_v43  ;;  %v5539_v42 = vld [vmem:[#allocation5 + $0xc84] ss:$16 sps:$4 sm:$0xff]   ;;  %v5542_v43 = vld [vmem:[#allocation5 + $0xc8c] ss:$16 sps:$4 sm:$0xff]  }
 0x1c4   :  { %3419 = vmatpush1.bf16.msra.mxu0 %v5447_v44  ;;  %3747 = vmatpush1.bf16.msra.mxu1 %v5450_v45  ;;  %v5537_v44 = vld [vmem:[#allocation5 + $0xc80] ss:$16 sps:$4 sm:$0xff]   ;;  %v5540_v45 = vld [vmem:[#allocation5 + $0xc88] ss:$16 sps:$4 sm:$0xff]  }
 0x1c5   :  { %3420 = vmatprep.subr.bf16.mxu0 %v5455_v46  ;;  %3748 = vmatprep.subr.bf16.mxu1 %v5458_v47  ;;  %v5545_v46 = vld [vmem:[#allocation5 + $0xca4] ss:$16 sps:$4 sm:$0xff]   ;;  %v5548_v47 = vld [vmem:[#allocation5 + $0xcac] ss:$16 sps:$4 sm:$0xff]  }
 0x1c8   :  { %3421 = vmatpush1.bf16.msra.mxu0 %v5453_v48  ;;  %3749 = vmatpush1.bf16.msra.mxu1 %v5456_v49  ;;  %v5543_v48 = vld [vmem:[#allocation5 + $0xca0] ss:$16 sps:$4 sm:$0xff]   ;;  %v5546_v49 = vld [vmem:[#allocation5 + $0xca8] ss:$16 sps:$4 sm:$0xff]  }
 0x1c9   :  { %3422 = vmatprep.subr.bf16.mxu0 %v5461_v50  ;;  %3750 = vmatprep.subr.bf16.mxu1 %v5464_v51  ;;  %v5551_v50 = vld [vmem:[#allocation5 + $0xcc4] ss:$16 sps:$4 sm:$0xff]   ;;  %v5554_v51 = vld [vmem:[#allocation5 + $0xccc] ss:$16 sps:$4 sm:$0xff]  }
 0x1cc   :  { %3423 = vmatpush1.bf16.msra.mxu0 %v5459_v52  ;;  %3751 = vmatpush1.bf16.msra.mxu1 %v5462_v53  ;;  %v5549_v52 = vld [vmem:[#allocation5 + $0xcc0] ss:$16 sps:$4 sm:$0xff]   ;;  %v5552_v53 = vld [vmem:[#allocation5 + $0xcc8] ss:$16 sps:$4 sm:$0xff]  }
 0x1cd   :  { %3424 = vmatprep.subr.bf16.mxu0 %v5467_v54  ;;  %3752 = vmatprep.subr.bf16.mxu1 %v5470_v55  ;;  %v5557_v54 = vld [vmem:[#allocation5 + $0xce4] ss:$16 sps:$4 sm:$0xff]   ;;  %v5560_v55 = vld [vmem:[#allocation5 + $0xcec] ss:$16 sps:$4 sm:$0xff]  }
 0x1d0   :  { %3425 = vmatpush1.bf16.msra.mxu0 %v5465_v56  ;;  %3753 = vmatpush1.bf16.msra.mxu1 %v5468_v57  ;;  %v5555_v56 = vld [vmem:[#allocation5 + $0xce0] ss:$16 sps:$4 sm:$0xff]   ;;  %v5558_v57 = vld [vmem:[#allocation5 + $0xce8] ss:$16 sps:$4 sm:$0xff]  }
 0x1d1   :  { %3426 = vmatprep.subr.bf16.mxu0 %v5473_v58  ;;  %3754 = vmatprep.subr.bf16.mxu1 %v5476_v59  ;;  %v5563_v58 = vld [vmem:[#allocation5 + $0xd04] ss:$16 sps:$4 sm:$0xff]   ;;  %v5566_v59 = vld [vmem:[#allocation5 + $0xd0c] ss:$16 sps:$4 sm:$0xff]  }
 0x1d4   :  { %3427 = vmatpush1.bf16.msra.mxu0 %v5471_v60  ;;  %3755 = vmatpush1.bf16.msra.mxu1 %v5474_v61  ;;  %v5561_v60 = vld [vmem:[#allocation5 + $0xd00] ss:$16 sps:$4 sm:$0xff]   ;;  %v5564_v61 = vld [vmem:[#allocation5 + $0xd08] ss:$16 sps:$4 sm:$0xff]  }
 0x1d5   :  { %3428 = vmatprep.subr.bf16.mxu0 %v5479_v62  ;;  %3756 = vmatprep.subr.bf16.mxu1 %v5482_v63  ;;  %v5569_v62 = vld [vmem:[#allocation5 + $0xd24] ss:$16 sps:$4 sm:$0xff]   ;;  %v5572_v63 = vld [vmem:[#allocation5 + $0xd2c] ss:$16 sps:$4 sm:$0xff]  }
 0x1d8   :  { %3429 = vmatpush1.bf16.msra.mxu0 %v5477_v0  ;;  %3757 = vmatpush1.bf16.msra.mxu1 %v5480_v1  ;;  %v5567_v0 = vld [vmem:[#allocation5 + $0xd20] ss:$16 sps:$4 sm:$0xff]   ;;  %v5570_v1 = vld [vmem:[#allocation5 + $0xd28] ss:$16 sps:$4 sm:$0xff]  }
 0x1d9   :  { %3430 = vmatprep.subr.bf16.mxu0 %v5485_v2  ;;  %3758 = vmatprep.subr.bf16.mxu1 %v5488_v3  ;;  %v5575_v2 = vld [vmem:[#allocation5 + $0xd44] ss:$16 sps:$4 sm:$0xff]   ;;  %v5578_v3 = vld [vmem:[#allocation5 + $0xd4c] ss:$16 sps:$4 sm:$0xff]  }
 0x1dc   :  { %3431 = vmatpush1.bf16.msra.mxu0 %v5483_v4  ;;  %3759 = vmatpush1.bf16.msra.mxu1 %v5486_v5  ;;  %v5573_v4 = vld [vmem:[#allocation5 + $0xd40] ss:$16 sps:$4 sm:$0xff]   ;;  %v5576_v5 = vld [vmem:[#allocation5 + $0xd48] ss:$16 sps:$4 sm:$0xff]  }
 0x1dd   :  { %3432 = vmatprep.subr.bf16.mxu0 %v5491_v6  ;;  %3760 = vmatprep.subr.bf16.mxu1 %v5494_v7  ;;  %v5581_v6 = vld [vmem:[#allocation5 + $0xd64] ss:$16 sps:$4 sm:$0xff]   ;;  %v5584_v7 = vld [vmem:[#allocation5 + $0xd6c] ss:$16 sps:$4 sm:$0xff]  }
 0x1e0   :  { %3433 = vmatpush1.bf16.msra.mxu0 %v5489_v8  ;;  %3761 = vmatpush1.bf16.msra.mxu1 %v5492_v9  ;;  %v5579_v8 = vld [vmem:[#allocation5 + $0xd60] ss:$16 sps:$4 sm:$0xff]   ;;  %v5582_v9 = vld [vmem:[#allocation5 + $0xd68] ss:$16 sps:$4 sm:$0xff]  }
 0x1e1   :  { %3434 = vmatprep.subr.bf16.mxu0 %v5497_v10  ;;  %3762 = vmatprep.subr.bf16.mxu1 %v5500_v11  ;;  %v5587_v10 = vld [vmem:[#allocation5 + $0xd84] ss:$16 sps:$4 sm:$0xff]   ;;  %v5590_v11 = vld [vmem:[#allocation5 + $0xd8c] ss:$16 sps:$4 sm:$0xff]  }
 0x1e4   :  { %3435 = vmatpush1.bf16.msra.mxu0 %v5495_v12  ;;  %3763 = vmatpush1.bf16.msra.mxu1 %v5498_v13  ;;  %v5585_v12 = vld [vmem:[#allocation5 + $0xd80] ss:$16 sps:$4 sm:$0xff]   ;;  %v5588_v13 = vld [vmem:[#allocation5 + $0xd88] ss:$16 sps:$4 sm:$0xff]  }
 0x1e5   :  { %3436 = vmatprep.subr.bf16.mxu0 %v5503_v14  ;;  %3764 = vmatprep.subr.bf16.mxu1 %v5506_v15  ;;  %v5593_v14 = vld [vmem:[#allocation5 + $0xda4] ss:$16 sps:$4 sm:$0xff]   ;;  %v5596_v15 = vld [vmem:[#allocation5 + $0xdac] ss:$16 sps:$4 sm:$0xff]  }
 0x1e8   :  { %3437 = vmatpush1.bf16.msra.mxu0 %v5501_v16  ;;  %3765 = vmatpush1.bf16.msra.mxu1 %v5504_v17  ;;  %v5591_v16 = vld [vmem:[#allocation5 + $0xda0] ss:$16 sps:$4 sm:$0xff]   ;;  %v5594_v17 = vld [vmem:[#allocation5 + $0xda8] ss:$16 sps:$4 sm:$0xff]  }
 0x1e9   :  { %3438 = vmatprep.subr.bf16.mxu0 %v5509_v18  ;;  %3766 = vmatprep.subr.bf16.mxu1 %v5512_v19  ;;  %v5599_v18 = vld [vmem:[#allocation5 + $0xdc4] ss:$16 sps:$4 sm:$0xff]   ;;  %v5602_v19 = vld [vmem:[#allocation5 + $0xdcc] ss:$16 sps:$4 sm:$0xff]  }
 0x1ec   :  { %3439 = vmatpush1.bf16.msra.mxu0 %v5507_v20  ;;  %3767 = vmatpush1.bf16.msra.mxu1 %v5510_v21  ;;  %v5597_v20 = vld [vmem:[#allocation5 + $0xdc0] ss:$16 sps:$4 sm:$0xff]   ;;  %v5600_v21 = vld [vmem:[#allocation5 + $0xdc8] ss:$16 sps:$4 sm:$0xff]  }
 0x1ed   :  { %3449 = vmatprep.subr.bf16.mxu0 %v5515_v23  ;;  %3777 = vmatprep.subr.bf16.mxu1 %v5518_v24  ;;  %v5608_v23 = vld [vmem:[#allocation5 + $0xdec] ss:$16 sps:$4 sm:$0xff]   ;;  %v5603_v24 = vld [vmem:[#allocation5 + $0xde0] ss:$16 sps:$4 sm:$0xff]  }
 0x1ef   :  { %3441 = vmatmul.mubr.bf16.vlgmr.msra.gmra.mrb[0].mxu0 %v125_v25  ;;  %3769 = vmatmul.mubr.bf16.vlgmr.msra.gmra.mrb[0].mxu1 %v125_v25  ;;  %v5606_v25 = vld [vmem:[#allocation5 + $0xde8] ss:$16 sps:$4 sm:$0xff]  }
 0x1f0   :  { %3450 = vmatpush1.bf16.msra.mxu0 %v5513_v27  ;;  %3778 = vmatpush1.bf16.msra.mxu1 %v5516_v28  ;;  %v5611_v27 = vld [vmem:[#allocation5 + $0xe04] ss:$16 sps:$4 sm:$0xff]   ;;  %v5614_v28 = vld [vmem:[#allocation5 + $0xe0c] ss:$16 sps:$4 sm:$0xff]  }
 0x1f1   :  { %3451 = vmatprep.subr.bf16.mxu0 %v5521_v29  ;;  %3779 = vmatprep.subr.bf16.mxu1 %v5524_v30  ;;  %v127_v29 = vpack.c.bf16 %v111_v26, %v111_v26  ;;  %v114_v30 = vld [vmem:[#allocation2 + $0x78] sm:$0xff]  ;;  %v5701_v26 = vld [vmem:[#allocation5 + $0xfe4] ss:$16 sps:$4 sm:$0xff]  }
 0x1f2   :  { %3481 = vmatprep.mubr.bf16.mxu0 %v128_v31  ;;  %3809 = vmatprep.mubr.bf16.mxu1 %v128_v31  ;;  %v5609_v31 = vld [vmem:[#allocation5 + $0xe00] ss:$16 sps:$4 sm:$0xff]  }
 0x1f4   :  { %3452 = vmatpush1.bf16.msra.mxu0 %v5519_v32  ;;  %3780 = vmatpush1.bf16.msra.mxu1 %v5522_v33  ;;  %v5612_v32 = vld [vmem:[#allocation5 + $0xe08] ss:$16 sps:$4 sm:$0xff]   ;;  %v5617_v33 = vld [vmem:[#allocation5 + $0xe24] ss:$16 sps:$4 sm:$0xff]  }
 0x1f5   :  { %3453 = vmatprep.subr.bf16.mxu0 %v5527_v34  ;;  %3781 = vmatprep.subr.bf16.mxu1 %v5530_v35  ;;  %v5620_v34 = vld [vmem:[#allocation5 + $0xe2c] ss:$16 sps:$4 sm:$0xff]   ;;  %v130_v35 = vpack.c.bf16 %v114_v30, %v114_v30  ;;  %v113_v30 = vld [vmem:[#allocation2 + $0x70] sm:$0xff] }
 0x1f8   :  { %3454 = vmatpush1.bf16.msra.mxu0 %v5525_v36  ;;  %3782 = vmatpush1.bf16.msra.mxu1 %v5528_v37  ;;  %v5615_v36 = vld [vmem:[#allocation5 + $0xe20] ss:$16 sps:$4 sm:$0xff]   ;;  %v5618_v37 = vld [vmem:[#allocation5 + $0xe28] ss:$16 sps:$4 sm:$0xff]  }
 0x1f9   :  { %3455 = vmatprep.subr.bf16.mxu0 %v5533_v38  ;;  %3783 = vmatprep.subr.bf16.mxu1 %v5536_v39  ;;  %v5623_v38 = vld [vmem:[#allocation5 + $0xe44] ss:$16 sps:$4 sm:$0xff]   ;;  %v5626_v39 = vld [vmem:[#allocation5 + $0xe4c] ss:$16 sps:$4 sm:$0xff]  }
 0x1fc   :  { %3456 = vmatpush1.bf16.msra.mxu0 %v5531_v40  ;;  %3784 = vmatpush1.bf16.msra.mxu1 %v5534_v41  ;;  %v5621_v40 = vld [vmem:[#allocation5 + $0xe40] ss:$16 sps:$4 sm:$0xff]   ;;  %v5624_v41 = vld [vmem:[#allocation5 + $0xe48] ss:$16 sps:$4 sm:$0xff]  }
 0x1fd   :  { %3457 = vmatprep.subr.bf16.mxu0 %v5539_v42  ;;  %3785 = vmatprep.subr.bf16.mxu1 %v5542_v43  ;;  %v5629_v42 = vld [vmem:[#allocation5 + $0xe64] ss:$16 sps:$4 sm:$0xff]   ;;  %v5632_v43 = vld [vmem:[#allocation5 + $0xe6c] ss:$16 sps:$4 sm:$0xff]  }
 0x200   :  { %3458 = vmatpush1.bf16.msra.mxu0 %v5537_v44  ;;  %3786 = vmatpush1.bf16.msra.mxu1 %v5540_v45  ;;  %v5627_v44 = vld [vmem:[#allocation5 + $0xe60] ss:$16 sps:$4 sm:$0xff]   ;;  %v5630_v45 = vld [vmem:[#allocation5 + $0xe68] ss:$16 sps:$4 sm:$0xff]  }
 0x201   :  { %3459 = vmatprep.subr.bf16.mxu0 %v5545_v46  ;;  %3787 = vmatprep.subr.bf16.mxu1 %v5548_v47  ;;  %v5635_v46 = vld [vmem:[#allocation5 + $0xe84] ss:$16 sps:$4 sm:$0xff]   ;;  %v5638_v47 = vld [vmem:[#allocation5 + $0xe8c] ss:$16 sps:$4 sm:$0xff]  }
 0x204   :  { %3460 = vmatpush1.bf16.msra.mxu0 %v5543_v48  ;;  %3788 = vmatpush1.bf16.msra.mxu1 %v5546_v49  ;;  %v5633_v48 = vld [vmem:[#allocation5 + $0xe80] ss:$16 sps:$4 sm:$0xff]   ;;  %v5636_v49 = vld [vmem:[#allocation5 + $0xe88] ss:$16 sps:$4 sm:$0xff]  }
 0x205   :  { %3461 = vmatprep.subr.bf16.mxu0 %v5551_v50  ;;  %3789 = vmatprep.subr.bf16.mxu1 %v5554_v51  ;;  %v5641_v50 = vld [vmem:[#allocation5 + $0xea4] ss:$16 sps:$4 sm:$0xff]   ;;  %v5644_v51 = vld [vmem:[#allocation5 + $0xeac] ss:$16 sps:$4 sm:$0xff]  }
 0x208   :  { %3462 = vmatpush1.bf16.msra.mxu0 %v5549_v52  ;;  %3790 = vmatpush1.bf16.msra.mxu1 %v5552_v53  ;;  %v5639_v52 = vld [vmem:[#allocation5 + $0xea0] ss:$16 sps:$4 sm:$0xff]   ;;  %v5642_v53 = vld [vmem:[#allocation5 + $0xea8] ss:$16 sps:$4 sm:$0xff]  }
 0x209   :  { %3463 = vmatprep.subr.bf16.mxu0 %v5557_v54  ;;  %3791 = vmatprep.subr.bf16.mxu1 %v5560_v55  ;;  %v5647_v54 = vld [vmem:[#allocation5 + $0xec4] ss:$16 sps:$4 sm:$0xff]   ;;  %v5650_v55 = vld [vmem:[#allocation5 + $0xecc] ss:$16 sps:$4 sm:$0xff]  }
 0x20c   :  { %3464 = vmatpush1.bf16.msra.mxu0 %v5555_v56  ;;  %3792 = vmatpush1.bf16.msra.mxu1 %v5558_v57  ;;  %v5645_v56 = vld [vmem:[#allocation5 + $0xec0] ss:$16 sps:$4 sm:$0xff]   ;;  %v5648_v57 = vld [vmem:[#allocation5 + $0xec8] ss:$16 sps:$4 sm:$0xff]  }
 0x20d   :  { %3465 = vmatprep.subr.bf16.mxu0 %v5563_v58  ;;  %3793 = vmatprep.subr.bf16.mxu1 %v5566_v59  ;;  %v5653_v58 = vld [vmem:[#allocation5 + $0xee4] ss:$16 sps:$4 sm:$0xff]   ;;  %v5656_v59 = vld [vmem:[#allocation5 + $0xeec] ss:$16 sps:$4 sm:$0xff]  }
 0x210   :  { %3466 = vmatpush1.bf16.msra.mxu0 %v5561_v60  ;;  %3794 = vmatpush1.bf16.msra.mxu1 %v5564_v61  ;;  %v5651_v60 = vld [vmem:[#allocation5 + $0xee0] ss:$16 sps:$4 sm:$0xff]   ;;  %v5654_v61 = vld [vmem:[#allocation5 + $0xee8] ss:$16 sps:$4 sm:$0xff]  }
 0x211   :  { %3467 = vmatprep.subr.bf16.mxu0 %v5569_v62  ;;  %3795 = vmatprep.subr.bf16.mxu1 %v5572_v63  ;;  %v5659_v62 = vld [vmem:[#allocation5 + $0xf04] ss:$16 sps:$4 sm:$0xff]   ;;  %v5662_v63 = vld [vmem:[#allocation5 + $0xf0c] ss:$16 sps:$4 sm:$0xff]  }
 0x214   :  { %3468 = vmatpush1.bf16.msra.mxu0 %v5567_v0  ;;  %3796 = vmatpush1.bf16.msra.mxu1 %v5570_v1  ;;  %v5657_v0 = vld [vmem:[#allocation5 + $0xf00] ss:$16 sps:$4 sm:$0xff]   ;;  %v5660_v1 = vld [vmem:[#allocation5 + $0xf08] ss:$16 sps:$4 sm:$0xff]  }
 0x215   :  { %3469 = vmatprep.subr.bf16.mxu0 %v5575_v2  ;;  %3797 = vmatprep.subr.bf16.mxu1 %v5578_v3  ;;  %v5665_v2 = vld [vmem:[#allocation5 + $0xf24] ss:$16 sps:$4 sm:$0xff]   ;;  %v5668_v3 = vld [vmem:[#allocation5 + $0xf2c] ss:$16 sps:$4 sm:$0xff]  }
 0x218   :  { %3470 = vmatpush1.bf16.msra.mxu0 %v5573_v4  ;;  %3798 = vmatpush1.bf16.msra.mxu1 %v5576_v5  ;;  %v5663_v4 = vld [vmem:[#allocation5 + $0xf20] ss:$16 sps:$4 sm:$0xff]   ;;  %v5666_v5 = vld [vmem:[#allocation5 + $0xf28] ss:$16 sps:$4 sm:$0xff]  }
 0x219   :  { %3471 = vmatprep.subr.bf16.mxu0 %v5581_v6  ;;  %3799 = vmatprep.subr.bf16.mxu1 %v5584_v7  ;;  %v5671_v6 = vld [vmem:[#allocation5 + $0xf44] ss:$16 sps:$4 sm:$0xff]   ;;  %v5674_v7 = vld [vmem:[#allocation5 + $0xf4c] ss:$16 sps:$4 sm:$0xff]  }
 0x21c   :  { %3472 = vmatpush1.bf16.msra.mxu0 %v5579_v8  ;;  %3800 = vmatpush1.bf16.msra.mxu1 %v5582_v9  ;;  %v5669_v8 = vld [vmem:[#allocation5 + $0xf40] ss:$16 sps:$4 sm:$0xff]   ;;  %v5672_v9 = vld [vmem:[#allocation5 + $0xf48] ss:$16 sps:$4 sm:$0xff]  }
 0x21d   :  { %3473 = vmatprep.subr.bf16.mxu0 %v5587_v10  ;;  %3801 = vmatprep.subr.bf16.mxu1 %v5590_v11  ;;  %v5677_v10 = vld [vmem:[#allocation5 + $0xf64] ss:$16 sps:$4 sm:$0xff]   ;;  %v5680_v11 = vld [vmem:[#allocation5 + $0xf6c] ss:$16 sps:$4 sm:$0xff]  }
 0x220   :  { %3474 = vmatpush1.bf16.msra.mxu0 %v5585_v12  ;;  %3802 = vmatpush1.bf16.msra.mxu1 %v5588_v13  ;;  %v5675_v12 = vld [vmem:[#allocation5 + $0xf60] ss:$16 sps:$4 sm:$0xff]   ;;  %v5678_v13 = vld [vmem:[#allocation5 + $0xf68] ss:$16 sps:$4 sm:$0xff]  }
 0x221   :  { %3475 = vmatprep.subr.bf16.mxu0 %v5593_v14  ;;  %3803 = vmatprep.subr.bf16.mxu1 %v5596_v15  ;;  %v5683_v14 = vld [vmem:[#allocation5 + $0xf84] ss:$16 sps:$4 sm:$0xff]   ;;  %v5686_v15 = vld [vmem:[#allocation5 + $0xf8c] ss:$16 sps:$4 sm:$0xff]  }
 0x224   :  { %3476 = vmatpush1.bf16.msra.mxu0 %v5591_v16  ;;  %3804 = vmatpush1.bf16.msra.mxu1 %v5594_v17  ;;  %v5681_v16 = vld [vmem:[#allocation5 + $0xf80] ss:$16 sps:$4 sm:$0xff]   ;;  %v5684_v17 = vld [vmem:[#allocation5 + $0xf88] ss:$16 sps:$4 sm:$0xff]  }
 0x225   :  { %3477 = vmatprep.subr.bf16.mxu0 %v5599_v18  ;;  %3805 = vmatprep.subr.bf16.mxu1 %v5602_v19  ;;  %v5689_v18 = vld [vmem:[#allocation5 + $0xfa4] ss:$16 sps:$4 sm:$0xff]   ;;  %v5692_v19 = vld [vmem:[#allocation5 + $0xfac] ss:$16 sps:$4 sm:$0xff]  }
 0x228   :  { %3478 = vmatpush1.bf16.msra.mxu0 %v5597_v20  ;;  %3806 = vmatpush1.bf16.msra.mxu1 %v5600_v21  ;;  %v5687_v20 = vld [vmem:[#allocation5 + $0xfa0] ss:$16 sps:$4 sm:$0xff]   ;;  %v5690_v21 = vld [vmem:[#allocation5 + $0xfa8] ss:$16 sps:$4 sm:$0xff]  }
 0x229   :  { %3479 = vmatprep.subr.bf16.mxu0 %v5605_v22  ;;  %3807 = vmatprep.subr.bf16.mxu1 %v5608_v23  ;;  %v5695_v22 = vld [vmem:[#allocation5 + $0xfc4] ss:$16 sps:$4 sm:$0xff]   ;;  %v5698_v23 = vld [vmem:[#allocation5 + $0xfcc] ss:$16 sps:$4 sm:$0xff]  }
 0x22c   :  { %3480 = vmatpush1.bf16.msra.mxu0 %v5603_v24  ;;  %3808 = vmatpush1.bf16.msra.mxu1 %v5606_v25  ;;  %v5693_v24 = vld [vmem:[#allocation5 + $0xfc0] ss:$16 sps:$4 sm:$0xff]   ;;  %v5696_v25 = vld [vmem:[#allocation5 + $0xfc8] ss:$16 sps:$4 sm:$0xff]  }
 0x22d   :  { %3490 = vmatprep.subr.bf16.mxu0 %v5611_v27  ;;  %3818 = vmatprep.subr.bf16.mxu1 %v5614_v28  ;;  %v5704_v27 = vld [vmem:[#allocation5 + $0xfec] ss:$16 sps:$4 sm:$0xff]   ;;  %v5699_v28 = vld [vmem:[#allocation5 + $0xfe0] ss:$16 sps:$4 sm:$0xff]  }
 0x22f   :  { %3482 = vmatmul.mubr.bf16.vlgmr.msra.gmra.mrb[0].mxu0 %v127_v29  ;;  %3810 = vmatmul.mubr.bf16.vlgmr.msra.gmra.mrb[0].mxu1 %v127_v29  ;;  %v5702_v29 = vld [vmem:[#allocation5 + $0xfe8] ss:$16 sps:$4 sm:$0xff]  }
 0x230   :  { %3491 = vmatpush1.bf16.msra.mxu0 %v5609_v31  ;;  %3819 = vmatpush1.bf16.msra.mxu1 %v5612_v32  ;;  %v5705_v31 = vld [vmem:[#allocation10 + $0x40] sm:$0xff]  }
 0x231   :  { %3492 = vmatprep.subr.bf16.mxu0 %v5617_v33  ;;  %3820 = vmatprep.subr.bf16.mxu1 %v5620_v34  ;;  %v5706_v32 = vld [vmem:[#allocation10 + $0xc0] sm:$0xff]   ;;  %v129_v33 = vpack.c.bf16 %v113_v30, %v113_v30 }
 0x232   :  { %3522 = vmatprep.mubr.bf16.mxu0 %v130_v35  ;;  %3850 = vmatprep.mubr.bf16.mxu1 %v130_v35  ;;  %v5707_v34 = vld [vmem:[#allocation10] sm:$0xff]  }
 0x233   :  { %v5708_v35 = vld [vmem:[#allocation10 + $0x80] sm:$0xff]  }
 0x234   :  { %3493 = vmatpush1.bf16.msra.mxu0 %v5615_v36  ;;  %3821 = vmatpush1.bf16.msra.mxu1 %v5618_v37  ;;  %v5709_v36 = vld [vmem:[#allocation10 + $0x48] sm:$0xff]  }
 0x235   :  { %3494 = vmatprep.subr.bf16.mxu0 %v5623_v38  ;;  %3822 = vmatprep.subr.bf16.mxu1 %v5626_v39  ;;  %v5710_v37 = vld [vmem:[#allocation10 + $0xc8] sm:$0xff]  }
 0x236   :  { %v5711_v38 = vld [vmem:[#allocation10 + $0x8] sm:$0xff]  }
 0x237   :  { %v5712_v39 = vld [vmem:[#allocation10 + $0x88] sm:$0xff]  }
 0x238   :  { %3495 = vmatpush1.bf16.msra.mxu0 %v5621_v40  ;;  %3823 = vmatpush1.bf16.msra.mxu1 %v5624_v41  ;;  %v5713_v40 = vld [vmem:[#allocation10 + $0x50] sm:$0xff]  }
 0x239   :  { %3496 = vmatprep.subr.bf16.mxu0 %v5629_v42  ;;  %3824 = vmatprep.subr.bf16.mxu1 %v5632_v43  ;;  %v5714_v41 = vld [vmem:[#allocation10 + $0xd0] sm:$0xff]  }
 0x23a   :  { %v5715_v42 = vld [vmem:[#allocation10 + $0x10] sm:$0xff]  }
 0x23b   :  { %v5716_v43 = vld [vmem:[#allocation10 + $0x90] sm:$0xff]  }
 0x23c   :  { %3497 = vmatpush1.bf16.msra.mxu0 %v5627_v44  ;;  %3825 = vmatpush1.bf16.msra.mxu1 %v5630_v45  ;;  %v5717_v44 = vld [vmem:[#allocation10 + $0x58] sm:$0xff]  }
 0x23d   :  { %3498 = vmatprep.subr.bf16.mxu0 %v5635_v46  ;;  %3826 = vmatprep.subr.bf16.mxu1 %v5638_v47  ;;  %v5718_v45 = vld [vmem:[#allocation10 + $0xd8] sm:$0xff]  }
 0x23e   :  { %v5719_v46 = vld [vmem:[#allocation10 + $0x18] sm:$0xff]  }
 0x23f   :  { %v5720_v47 = vld [vmem:[#allocation10 + $0x98] sm:$0xff]  }
 0x240   :  { %3499 = vmatpush1.bf16.msra.mxu0 %v5633_v48  ;;  %3827 = vmatpush1.bf16.msra.mxu1 %v5636_v49  ;;  %v5721_v48 = vld [vmem:[#allocation10 + $0x60] sm:$0xff]  }
 0x241   :  { %3500 = vmatprep.subr.bf16.mxu0 %v5641_v50  ;;  %3828 = vmatprep.subr.bf16.mxu1 %v5644_v51  ;;  %v5722_v49 = vld [vmem:[#allocation10 + $0xe0] sm:$0xff]  }
 0x242   :  { %v5723_v50 = vld [vmem:[#allocation10 + $0x20] sm:$0xff]  }
 0x243   :  { %v5724_v51 = vld [vmem:[#allocation10 + $0xa0] sm:$0xff]  }
 0x244   :  { %3501 = vmatpush1.bf16.msra.mxu0 %v5639_v52  ;;  %3829 = vmatpush1.bf16.msra.mxu1 %v5642_v53  ;;  %v5725_v52 = vld [vmem:[#allocation10 + $0x68] sm:$0xff]  }
 0x245   :  { %3502 = vmatprep.subr.bf16.mxu0 %v5647_v54  ;;  %3830 = vmatprep.subr.bf16.mxu1 %v5650_v55  ;;  %v5726_v53 = vld [vmem:[#allocation10 + $0xe8] sm:$0xff]  }
 0x246   :  { %v5727_v54 = vld [vmem:[#allocation10 + $0x28] sm:$0xff]  }
 0x247   :  { %v5728_v55 = vld [vmem:[#allocation10 + $0xa8] sm:$0xff]  }
 0x248   :  { %3503 = vmatpush1.bf16.msra.mxu0 %v5645_v56  ;;  %3831 = vmatpush1.bf16.msra.mxu1 %v5648_v57  ;;  %v5729_v56 = vld [vmem:[#allocation10 + $0x70] sm:$0xff]  }
 0x249   :  { %3504 = vmatprep.subr.bf16.mxu0 %v5653_v58  ;;  %3832 = vmatprep.subr.bf16.mxu1 %v5656_v59  ;;  %v5730_v57 = vld [vmem:[#allocation10 + $0xf0] sm:$0xff]  }
 0x24a   :  { %v5731_v58 = vld [vmem:[#allocation10 + $0x30] sm:$0xff]  }
 0x24b   :  { %v5732_v59 = vld [vmem:[#allocation10 + $0xb0] sm:$0xff]  }
 0x24c   :  { %3505 = vmatpush1.bf16.msra.mxu0 %v5651_v60  ;;  %3833 = vmatpush1.bf16.msra.mxu1 %v5654_v61  ;;  %v5733_v60 = vld [vmem:[#allocation10 + $0x78] sm:$0xff]  }
 0x24d   :  { %3506 = vmatprep.subr.bf16.mxu0 %v5659_v62  ;;  %3834 = vmatprep.subr.bf16.mxu1 %v5662_v63  ;;  %v5734_v61 = vld [vmem:[#allocation10 + $0xf8] sm:$0xff]  }
 0x24e   :  { %v5735_v62 = vld [vmem:[#allocation10 + $0x38] sm:$0xff]  }
 0x24f   :  { %v5736_v63 = vld [vmem:[#allocation10 + $0xb8] sm:$0xff]  }
 0x250   :  { %3507 = vmatpush1.bf16.msra.mxu0 %v5657_v0  ;;  %3835 = vmatpush1.bf16.msra.mxu1 %v5660_v1  ;;  %v3861_v0 = vlaneseq }
 0x251   :  { %3508 = vmatprep.subr.bf16.mxu0 %v5665_v2  ;;  %3836 = vmatprep.subr.bf16.mxu1 %v5668_v3 }
 0x252   :  { %v3862_v1 = vshrl.u32 %v3861_v0, 7 }
 0x254   :  { %3509 = vmatpush1.bf16.msra.mxu0 %v5663_v4  ;;  %3837 = vmatpush1.bf16.msra.mxu1 %v5666_v5  ;;  %v3863_v2 = vsub.s32 0, %v3862_v1  ;;  %v3871_v3 = vsub.s32 2, %v3862_v1  ;;  %v3859_v4 = vld [vmem:[#allocation7] sm:$0xf]  ;;  %v3867_v5 = vsub.s32 1, %v3862_v1 }
 0x255   :  { %3510 = vmatprep.subr.bf16.mxu0 %v5671_v6  ;;  %3838 = vmatprep.subr.bf16.mxu1 %v5674_v7  ;;  %v3875_v6 = vsub.s32 3, %v3862_v1  ;;  %v3885_v7 = vld [vmem:[#allocation8] sm:$0xf] }
 0x258   :  { %3511 = vmatpush1.bf16.msra.mxu0 %v5669_v8  ;;  %3839 = vmatpush1.bf16.msra.mxu1 %v5672_v9  ;;  %v3864_v8 = vrot.slane %v3859_v4, %v3863_v2  ;;  %v3872_v9 = vrot.slane %v3859_v4, %v3871_v3 }
 0x259   :  { %3512 = vmatprep.subr.bf16.mxu0 %v5677_v10  ;;  %3840 = vmatprep.subr.bf16.mxu1 %v5680_v11  ;;  %v3868_v10 = vrot.slane %v3859_v4, %v3867_v5  ;;  %v3876_v11 = vrot.slane %v3859_v4, %v3875_v6 }
 0x25c   :  { %3513 = vmatpush1.bf16.msra.mxu0 %v5675_v12  ;;  %3841 = vmatpush1.bf16.msra.mxu1 %v5678_v13  ;;  %v3890_v12 = vrot.slane %v3885_v7, %v3863_v2  ;;  %v3898_v13 = vrot.slane %v3885_v7, %v3871_v3 }
 0x25d   :  { %3514 = vmatprep.subr.bf16.mxu0 %v5683_v14  ;;  %3842 = vmatprep.subr.bf16.mxu1 %v5686_v15 }
 0x260   :  { %3515 = vmatpush1.bf16.msra.mxu0 %v5681_v16  ;;  %3843 = vmatpush1.bf16.msra.mxu1 %v5684_v17  ;;  %v3894_v16 = vrot.slane %v3885_v7, %v3867_v5  ;;  %v3902_v17 = vrot.slane %v3885_v7, %v3875_v6 }
 0x261   :  { %3516 = vmatprep.subr.bf16.mxu0 %v5689_v18  ;;  %3844 = vmatprep.subr.bf16.mxu1 %v5692_v19 }
 0x264   :  { %3517 = vmatpush1.bf16.msra.mxu0 %v5687_v20  ;;  %3845 = vmatpush1.bf16.msra.mxu1 %v5690_v21 }
 0x265   :  { %3518 = vmatprep.subr.bf16.mxu0 %v5695_v22  ;;  %3846 = vmatprep.subr.bf16.mxu1 %v5698_v23 }
 0x268   :  { %3519 = vmatpush1.bf16.msra.mxu0 %v5693_v24  ;;  %3847 = vmatpush1.bf16.msra.mxu1 %v5696_v25 }
 0x269   :  { %3520 = vmatprep.subr.bf16.mxu0 %v5701_v26  ;;  %3848 = vmatprep.subr.bf16.mxu1 %v5704_v27 }
 0x26c   :  { %3521 = vmatpush1.bf16.msra.mxu0 %v5699_v28  ;;  %3849 = vmatpush1.bf16.msra.mxu1 %v5702_v29 }
 0x26d   :  { %4826 = vmatprep.subr.bf16.mxu0 %v5705_v31  ;;  %4848 = vmatprep.subr.bf16.mxu1 %v5706_v32 }
 0x26f   :  { %3523 = vmatmul.mubr.bf16.vlgmr.msra.gmra.mrb[0].mxu0 %v129_v33  ;;  %3851 = vmatmul.mubr.bf16.vlgmr.msra.gmra.mrb[0].mxu1 %v129_v33 }
 0x270   :  { %4827 = vmatpush3.bf16.msra.mxu0 %v5707_v34  ;;  %4849 = vmatpush3.bf16.msra.mxu1 %v5708_v35 }
 0x271   :  { %4828 = vmatprep.subr.bf16.mxu0 %v5709_v36  ;;  %4850 = vmatprep.subr.bf16.mxu1 %v5710_v37 }
 0x274   :  { %4829 = vmatpush3.bf16.msra.mxu0 %v5711_v38  ;;  %4851 = vmatpush3.bf16.msra.mxu1 %v5712_v39 }
 0x275   :  { %4830 = vmatprep.subr.bf16.mxu0 %v5713_v40  ;;  %4852 = vmatprep.subr.bf16.mxu1 %v5714_v41 }
 0x278   :  { %4831 = vmatpush3.bf16.msra.mxu0 %v5715_v42  ;;  %4853 = vmatpush3.bf16.msra.mxu1 %v5716_v43  ;;  %v4793_v42 = vld [vmem:[#allocation11] ss:$0 sm:$0xff] }
 0x279   :  { %4832 = vmatprep.subr.bf16.mxu0 %v5717_v44  ;;  %4854 = vmatprep.subr.bf16.mxu1 %v5718_v45 }
 0x27c   :  { %4833 = vmatpush3.bf16.msra.mxu0 %v5719_v46  ;;  %4855 = vmatpush3.bf16.msra.mxu1 %v5720_v47 }
 0x27d   :  { %4834 = vmatprep.subr.bf16.mxu0 %v5721_v48  ;;  %4856 = vmatprep.subr.bf16.mxu1 %v5722_v49 }
 0x280   :  { %4835 = vmatpush3.bf16.msra.mxu0 %v5723_v50  ;;  %4857 = vmatpush3.bf16.msra.mxu1 %v5724_v51 }
 0x281   :  { %4836 = vmatprep.subr.bf16.mxu0 %v5725_v52  ;;  %4858 = vmatprep.subr.bf16.mxu1 %v5726_v53 }
 0x284   :  { %4837 = vmatpush3.bf16.msra.mxu0 %v5727_v54  ;;  %4859 = vmatpush3.bf16.msra.mxu1 %v5728_v55 }
 0x285   :  { %4838 = vmatprep.subr.bf16.mxu0 %v5729_v56  ;;  %4860 = vmatprep.subr.bf16.mxu1 %v5730_v57 }
 0x288   :  { %4839 = vmatpush3.bf16.msra.mxu0 %v5731_v58  ;;  %4861 = vmatpush3.bf16.msra.mxu1 %v5732_v59 }
 0x289   :  { %4840 = vmatprep.subr.bf16.mxu0 %v5733_v60  ;;  %4862 = vmatprep.subr.bf16.mxu1 %v5734_v61 }
 0x28c   :  { %4841 = vmatpush3.bf16.msra.mxu0 %v5735_v62  ;;  %4863 = vmatpush3.bf16.msra.mxu1 %v5736_v63 }
 0x342   :  { %v3524_v14 = vpop.f32.mrb[0].mxu0  ;;  %v3852_v15 = vpop.f32.mrb[0].mxu1 }
 0x343   :  { %v3881_v18 = vmul.f32 %v3864_v8, %v3524_v14  ;;  %v3883_v19 = vmul.f32 %v3872_v9, %v3852_v15  ;;  %v3526_v20 = vpop.f32.mrb[1].mxu0  ;;  %v3854_v21 = vpop.f32.mrb[1].mxu1 }
 0x344   :  { %v3882_v22 = vmul.f32 %v3868_v10, %v3526_v20  ;;  %v3884_v23 = vmul.f32 %v3876_v11, %v3854_v21  ;;  %v3528_v24 = vpop.f32.mrb[2].mxu0  ;;  %v3856_v25 = vpop.f32.mrb[2].mxu1 }
 0x345   :  { %v3907_v26 = vadd.f32 %v3890_v12, %v3881_v18  ;;  %v3909_v27 = vadd.f32 %v3898_v13, %v3883_v19  ;;  %v3529_v28 = vpop.f32.mrb[3].mxu0  ;;  %v3857_v29 = vpop.f32.mrb[3].mxu1 }
 0x346   :  { %v3908_v30 = vadd.f32 %v3894_v16, %v3882_v22  ;;  %v3910_v31 = vadd.f32 %v3902_v17, %v3884_v23 }
 0x347   :  { %v3911_v32 = vmax.f32 %v3907_v26, 0.0  ;;  %v3913_v33 = vmax.f32 %v3909_v27, 0.0 }
 0x348   :  { %v3912_v34 = vmax.f32 %v3908_v30, 0.0  ;;  %v3914_v35 = vmax.f32 %v3910_v31, 0.0 }
 0x349   :  { %v3915_v38 = vpack.c.bf16 %v3911_v32, %v3911_v32  ;;  %v3917_v39 = vpack.c.bf16 %v3913_v33, %v3913_v33 }
 0x34a   :  { %v3916_v36 = vpack.c.bf16 %v3912_v34, %v3912_v34  ;;  %v3918_v37 = vpack.c.bf16 %v3914_v35, %v3914_v35 }
 0x34c   :  { %4214 = vmatprep.mubr.bf16.mxu0 %v3916_v36  ;;  %4254 = vmatprep.mubr.bf16.mxu1 %v3918_v37 }
 0x34d   :  { %4215 = vmatmul.mubr.bf16.vlgmr.msra.gmra.mrb[4].mxu0 %v3915_v38  ;;  %4255 = vmatmul.mubr.bf16.vlgmr.msra.gmra.mrb[4].mxu1 %v3917_v39 }
 0x420   :  { %v4842_v40 = vpop.f32.mrb[4].mxu0  ;;  %v4864_v41 = vpop.f32.mrb[4].mxu1 }
 0x421   :  { %v4843_v43 = vpop.f32.mrb[5].mxu0  ;;  %v4865_v44 = vpop.f32.mrb[5].mxu1 }
 0x422   :  { %v4844_v45 = vadd.f32 %v4843_v43, %v4842_v40  ;;  %v4866_v46 = vadd.f32 %v4865_v44, %v4864_v41  ;;  %v4845_v47 = vpop.f32.mrb[6].mxu0  ;;  %v4867_v48 = vpop.f32.mrb[6].mxu1 }
 0x423   :  { %v4846_v49 = vpop.f32.mrb[7].mxu0  ;;  %v4868_v50 = vpop.f32.mrb[7].mxu1 }
 0x424   :  { %v4217_v51 = vadd.f32 %v4844_v45, %v4793_v42 }
 0x426   :  { %v4257_v52 = vadd.f32 %v4866_v46, %v4217_v51 }
 0x428   :  { %4262 = vst [vmem:[#allocation13] sm:$0xff] %v4257_v52 }
 0x429   :  { %5880 = shalt.err (!%p5877_p10)
}
 0x42a   :  { %s5881_s1 = scalar_lea.hbm %s6037_s6, 128 }
 0x42b   :  { %p5882_p11 = scmp.ne.s32.totalorder %s6037_s6, %s5881_s1  ;;  %p5885_p12 = scmp.lt.u32.totalorder %s5881_s1, %s6037_s6 }
 0x42d   :  { %p5887_p13 = pnand %p5885_p12, %p5882_p11 }
 0x42f   :  { %5890 = shalt.err (!%p5887_p13)
}
 0x430   :  { %4272 = dma.vmem_to_hbm [thread:$0]  %s4270_s20, 128, %s6037_s6, [#allocation4]  }
 0x431   :  { %5899 = dma.done.wait [#allocation4], 128  }
 0x432   :  { %5900 = vsyncadd [#allocation4], 4294967168 }
 0x433   :  { %4276 = vsyncpa [#allocation3], 1 }
 0x434   :  { %4277 = vsyncpa [#allocation6], 1 }
 0x435   :  { %4278 = vsyncpa [#allocation9], 1 }
 0x436   :  { %4279 = vsyncpa [#allocation12], 1 }
 0x437   :  { %4280 = vsyncpa [#allocation4], 1 }

</bundles_post_ra>
